<compile_context>
chip_gen: v7x
topology: tpu7x:2x2x1
jax: 0.10.0
libtpu: 0.0.40
codegen_flags: <defaults>
</compile_context>

<pallas_src>
import math
import functools

import jax
import jax.numpy as jnp
import numpy as np
from jax.experimental import pallas as pl
from jax.experimental.pallas import tpu as pltpu


def _layer_norm(x, gamma, beta, eps=1e-5):
    # x: (T, E) f32, gamma/beta: (1, E) f32
    mu = jnp.mean(x, axis=-1, keepdims=True)
    xc = x - mu
    var = jnp.mean(xc * xc, axis=-1, keepdims=True)
    inv = jax.lax.rsqrt(var + eps)
    return xc * inv * gamma + beta


def attention_block_kernel(
    xq_ref,                                  # (TQ, E) f32 — query rows of x
    xkv_ref,                                 # (S,  E) bf16 — full sequence of this batch
    wq_ref, wk_ref, wv_ref,                  # (E, E) bf16 (wq pre-scaled by 1/sqrt(D))
    bq_ref, bk_ref, bv_ref,                  # (1, E) f32  (bq pre-scaled)
    wo_ref, bo_ref,                          # (E, E) bf16, (1, E) f32
    g1_ref, be1_ref,                         # layernorm1 gamma/beta (1, E) f32
    wf1_ref, bf1_ref,                        # (E, 4E) bf16, (1, 4E) f32
    wf2_ref, bf2_ref,                        # (4E, E) bf16, (1, E) f32
    g2_ref, be2_ref,                         # layernorm2 gamma/beta (1, E) f32
    o_ref,                                   # (TQ, E) f32
    k_sc, v_sc,                              # (S, E) bf16 VMEM scratch (cached K/V)
    ctx_sc,                                  # (TQ, E) f32 VMEM scratch (per-head ctx)
    *,
    num_heads,
):
    bf16 = jnp.bfloat16
    xq = xq_ref[...]                         # (TQ, E) f32
    TQ, E = xq.shape
    H = num_heads
    D = E // H

    # ---- K/V projections: computed once per batch row (qi == 0), cached ------
    @pl.when(pl.program_id(1) == 0)
    def _():
        xkv_b = xkv_ref[...]                 # (S, E) bf16 (cast done in wrapper)
        k_sc[...] = (jnp.dot(xkv_b, wk_ref[...],
                             preferred_element_type=jnp.float32)
                     + bk_ref[...]).astype(bf16)
        v_sc[...] = (jnp.dot(xkv_b, wv_ref[...],
                             preferred_element_type=jnp.float32)
                     + bv_ref[...]).astype(bf16)

    # ---- Q projection (bf16 MXU, f32 accumulate); 1/sqrt(D) already in wq/bq --
    xq_b = xq.astype(bf16)
    q = (jnp.dot(xq_b, wq_ref[...], preferred_element_type=jnp.float32)
         + bq_ref[...]).astype(bf16)
    k = k_sc[...]                            # (S, E) bf16
    v = v_sc[...]                            # (S, E) bf16

    # ---- per-head attention via static lane slices; ctx written to VMEM slab --
    # TODO(synk): for D < 128 consider a batched einsum over a (TQ, H, D) layout
    #             instead of H static lane slices (better MXU K-dim utilization).
    for h in range(H):
        sl = slice(h * D, (h + 1) * D)
        q_h = q[:, sl]                       # (TQ, D) bf16
        k_h = k[:, sl]                       # (S,  D) bf16
        v_h = v[:, sl]                       # (S,  D) bf16

        s = jnp.einsum('qd,kd->qk', q_h, k_h,
                       preferred_element_type=jnp.float32)      # (TQ, S) f32
        s = s - jnp.max(s, axis=-1, keepdims=True)
        p = jnp.exp(s)
        p = p * pl.reciprocal(jnp.sum(p, axis=-1, keepdims=True), approx=True)
        ctx_sc[:, sl] = jnp.dot(p.astype(bf16), v_h,
                                preferred_element_type=jnp.float32)

    attn_out = jnp.dot(ctx_sc[...].astype(bf16), wo_ref[...],
                       preferred_element_type=jnp.float32) + bo_ref[...]

    # ---- residual + layernorm 1 (f32) -----------------------------------------
    y = _layer_norm(xq + attn_out, g1_ref[...], be1_ref[...])

    # ---- feed-forward (bf16 MXU, f32 accumulate) -------------------------------
    h1 = jnp.dot(y.astype(bf16), wf1_ref[...],
                 preferred_element_type=jnp.float32) + bf1_ref[...]
    h1 = jnp.maximum(h1, 0.0)
    f = jnp.dot(h1.astype(bf16), wf2_ref[...],
                preferred_element_type=jnp.float32) + bf2_ref[...]

    # ---- residual + layernorm 2 -------------------------------------------------
    o_ref[...] = _layer_norm(y + f, g2_ref[...], be2_ref[...])


def _tpu_vmem_budget():
    """Generation-aware VMEM request + preferred query-tile sizes."""
    try:
        cap = pltpu.get_tpu_info().vmem_capacity_bytes
    except Exception:
        cap = 128 * 1024 * 1024
    if cap <= 64 * 1024 * 1024:
        # v7x: 64 MiB per TensorCore — leave headroom for compiler scratch.
        return cap - 8 * 1024 * 1024, (256, 128)
    # v5e / v6e: 128 MiB physical.
    return 100 * 1024 * 1024, (512, 256, 128)


def _pick_q_tile(S, prefs):
    for t in prefs:
        if S % t == 0:
            return t
    return S                                   # small / odd S: one tile


def _const_spec(shape):
    """Constant-index block (weights/biases): single-buffer to save VMEM."""
    index_map = lambda b, qi: (0, 0)
    try:
        return pl.BlockSpec(shape, index_map, pipeline_mode=pl.Buffered(1))
    except TypeError:  # older jax without pipeline_mode: fall back to default
        return pl.BlockSpec(shape, index_map)


def _prepare_params(params, num_heads):
    """One-time parameter prep: cast matmul weights to bf16, fold q scale.

    In a real model this runs once at parameter-load time, not per call.
    """
    E = params["wq"].shape[0]
    D = E // num_heads
    scale = jnp.float32(1.0 / math.sqrt(D))
    bf16 = jnp.bfloat16
    f32 = jnp.float32
    return {
        "wq": (params["wq"].astype(f32) * scale).astype(bf16),
        "bq": params["bq"].astype(f32) * scale,
        "wk": params["wk"].astype(bf16),
        "bk": params["bk"].astype(f32),
        "wv": params["wv"].astype(bf16),
        "bv": params["bv"].astype(f32),
        "wo": params["wo"].astype(bf16),
        "bo": params["bo"].astype(f32),
        "ln1_g": params["ln1_g"].astype(f32),
        "ln1_b": params["ln1_b"].astype(f32),
        "wf1": params["wf1"].astype(bf16),
        "bf1": params["bf1"].astype(f32),
        "wf2": params["wf2"].astype(bf16),
        "bf2": params["bf2"].astype(f32),
        "ln2_g": params["ln2_g"].astype(f32),
        "ln2_b": params["ln2_b"].astype(f32),
    }


def attention_block(x, params, num_heads):
    """x: (B, S, E) float32.  params: dict of pre-transposed (in, out) weights."""
    B, S, E = x.shape
    F = 4 * E
    assert E % num_heads == 0, "embed_dim must be divisible by num_heads"
    # TODO(synk): pad S to a multiple of 8 (sublane) for odd sequence lengths.
    assert (S % 8 == 0) or (B == 1), "S must be a multiple of 8 when B > 1"

    vmem_limit, tile_prefs = _tpu_vmem_budget()
    TQ = _pick_q_tile(S, tile_prefs)
    QT = S // TQ

    p = _prepare_params(params, num_heads)

    # Dense 2-D (B*S, E) slabs: lane-dense blocks, no size-1 leading dim, and
    # per-batch rows stay contiguous for the kv block.  The K/V operand is a
    # one-time bf16 copy (halves its per-step DMA + double buffer).
    x2d = x.reshape(B * S, E).astype(jnp.float32)
    xkv_bf16 = x2d.astype(jnp.bfloat16)

    q_spec = pl.BlockSpec((TQ, E), lambda b, qi: (b * QT + qi, 0))
    kv_spec = pl.BlockSpec((S, E), lambda b, qi: (b, 0))

    in_specs = [
        q_spec,                                                  # x (query rows, f32)
        kv_spec,                                                 # x (key/value rows, bf16)
        _const_spec((E, E)), _const_spec((E, E)), _const_spec((E, E)),   # wq wk wv
        _const_spec((1, E)), _const_spec((1, E)), _const_spec((1, E)),   # bq bk bv
        _const_spec((E, E)), _const_spec((1, E)),                        # wo bo
        _const_spec((1, E)), _const_spec((1, E)),                        # ln1 gamma/beta
        _const_spec((E, F)), _const_spec((1, F)),                        # ff w1 b1
        _const_spec((F, E)), _const_spec((1, E)),                        # ff w2 b2
        _const_spec((1, E)), _const_spec((1, E)),                        # ln2 gamma/beta
    ]

    # Advisory cost estimate (helps XLA schedule around this custom call).
    flops = int(B * S * E * (24 * E + 4 * S))
    transcendentals = int(B * num_heads * S * S + 2 * B * S)
    bytes_accessed = int((4 + 2 + 4) * B * S * E + 2 * 24 * E * E)

    kernel = functools.partial(attention_block_kernel, num_heads=num_heads)

    out2d = pl.pallas_call(
        kernel,
        out_shape=jax.ShapeDtypeStruct((B * S, E), jnp.float32),
        grid_spec=pltpu.PrefetchScalarGridSpec(
            num_scalar_prefetch=0,
            grid=(B, QT),
            in_specs=in_specs,
            out_specs=pl.BlockSpec((TQ, E), lambda b, qi: (b * QT + qi, 0)),
            scratch_shapes=[
                pltpu.VMEM((S, E), jnp.bfloat16),    # cached K
                pltpu.VMEM((S, E), jnp.bfloat16),    # cached V
                pltpu.VMEM((TQ, E), jnp.float32),    # per-head context slab
            ],
        ),
        compiler_params=pltpu.CompilerParams(
            # qi must be sequential so the qi==0 K/V cache fill is seen by all
            # later query tiles of the same batch row; b stays parallel.
            dimension_semantics=("parallel", "arbitrary"),
            vmem_limit_bytes=vmem_limit,
        ),
        cost_estimate=pl.CostEstimate(
            flops=flops,
            transcendentals=transcendentals,
            bytes_accessed=bytes_accessed,
        ),
    )(
        x2d, xkv_bf16,
        p["wq"], p["wk"], p["wv"],
        p["bq"], p["bk"], p["bv"],
        p["wo"], p["bo"],
        p["ln1_g"], p["ln1_b"],
        p["wf1"], p["bf1"],
        p["wf2"], p["bf2"],
        p["ln2_g"], p["ln2_b"],
    )
    return out2d.reshape(B, S, E)


# ----------------------------- pure-JAX reference (f32) ----------------------
def reference(x, p, num_heads):
    B, S, E = x.shape
    H, D = num_heads, E // num_heads

    def ln(v, g, b, eps=1e-5):
        mu = v.mean(-1, keepdims=True)
        var = ((v - mu) ** 2).mean(-1, keepdims=True)
        return (v - mu) / jnp.sqrt(var + eps) * g + b

    q = x @ p["wq"] + p["bq"]
    k = x @ p["wk"] + p["bk"]
    v = x @ p["wv"] + p["bv"]
    qh = q.reshape(B, S, H, D).transpose(0, 2, 1, 3) / math.sqrt(D)
    kh = k.reshape(B, S, H, D).transpose(0, 2, 1, 3)
    vh = v.reshape(B, S, H, D).transpose(0, 2, 1, 3)
    s = jnp.einsum("bhqd,bhkd->bhqk", qh, kh)
    a = jax.nn.softmax(s, axis=-1)
    ctx = jnp.einsum("bhqk,bhkd->bhqd", a, vh).transpose(0, 2, 1, 3).reshape(B, S, E)
    attn_out = ctx @ p["wo"] + p["bo"]
    y = ln(x + attn_out, p["ln1_g"], p["ln1_b"])
    h = jax.nn.relu(y @ p["wf1"] + p["bf1"])
    f = h @ p["wf2"] + p["bf2"]
    return ln(y + f, p["ln2_g"], p["ln2_b"])


if __name__ == "__main__":
    B, S, E, H = 2, 8, 32, 4
    F = 4 * E

    key = jax.random.PRNGKey(0)
    keys = jax.random.split(key, 16)
    scale = 0.05

    params = {
        "wq": jax.random.normal(keys[0], (E, E), jnp.float32) * scale,
        "wk": jax.random.normal(keys[1], (E, E), jnp.float32) * scale,
        "wv": jax.random.normal(keys[2], (E, E), jnp.float32) * scale,
        "bq": jax.random.normal(keys[3], (1, E), jnp.float32) * scale,
        "bk": jax.random.normal(keys[4], (1, E), jnp.float32) * scale,
        "bv": jax.random.normal(keys[5], (1, E), jnp.float32) * scale,
        "wo": jax.random.normal(keys[6], (E, E), jnp.float32) * scale,
        "bo": jax.random.normal(keys[7], (1, E), jnp.float32) * scale,
        "ln1_g": jnp.ones((1, E), jnp.float32),
        "ln1_b": jnp.zeros((1, E), jnp.float32),
        "wf1": jax.random.normal(keys[8], (E, F), jnp.float32) * scale,
        "bf1": jax.random.normal(keys[9], (1, F), jnp.float32) * scale,
        "wf2": jax.random.normal(keys[10], (F, E), jnp.float32) * scale,
        "bf2": jax.random.normal(keys[11], (1, E), jnp.float32) * scale,
        "ln2_g": jnp.ones((1, E), jnp.float32),
        "ln2_b": jnp.zeros((1, E), jnp.float32),
    }

    x = jax.random.normal(keys[12], (B, S, E), jnp.float32)

    out = attention_block(x, params, num_heads=H)
    out = jax.block_until_ready(out)

    ref = reference(x, params, num_heads=H)
    # bf16 matmul operands + approx softmax reciprocal -> loosened tolerance
    # vs. the f32 reference.
    np.testing.assert_allclose(np.asarray(out), np.asarray(ref),
                               rtol=3e-2, atol=3e-2)
    print("KERNEL_OK")
</pallas_src>

<mosaic_0001>
module attributes {stable_mosaic.version = 11 : i64} {
  func.func @attention_block_kernel(%arg0: i32, %arg1: i32, %arg2: memref<8x32xf32, #tpu.memory_space<vmem>>, %arg3: memref<8x32xbf16, #tpu.memory_space<vmem>>, %arg4: memref<32x32xbf16, #tpu.memory_space<vmem>>, %arg5: memref<32x32xbf16, #tpu.memory_space<vmem>>, %arg6: memref<32x32xbf16, #tpu.memory_space<vmem>>, %arg7: memref<1x32xf32, #tpu.memory_space<vmem>>, %arg8: memref<1x32xf32, #tpu.memory_space<vmem>>, %arg9: memref<1x32xf32, #tpu.memory_space<vmem>>, %arg10: memref<32x32xbf16, #tpu.memory_space<vmem>>, %arg11: memref<1x32xf32, #tpu.memory_space<vmem>>, %arg12: memref<1x32xf32, #tpu.memory_space<vmem>>, %arg13: memref<1x32xf32, #tpu.memory_space<vmem>>, %arg14: memref<32x128xbf16, #tpu.memory_space<vmem>>, %arg15: memref<1x128xf32, #tpu.memory_space<vmem>>, %arg16: memref<128x32xbf16, #tpu.memory_space<vmem>>, %arg17: memref<1x32xf32, #tpu.memory_space<vmem>>, %arg18: memref<1x32xf32, #tpu.memory_space<vmem>>, %arg19: memref<1x32xf32, #tpu.memory_space<vmem>>, %arg20: memref<8x32xf32, #tpu.memory_space<vmem>>, %arg21: memref<8x32xbf16, #tpu.memory_space<vmem>>, %arg22: memref<8x32xbf16, #tpu.memory_space<vmem>>, %arg23: memref<8x32xf32, #tpu.memory_space<vmem>>) attributes {dimension_semantics = [#tpu.dimension_semantics<parallel>, #tpu.dimension_semantics<arbitrary>], iteration_bounds = array<i64: 2, 1>, scalar_prefetch = 0 : i64, scratch_operands = 3 : i64, tpu.core_type = #tpu.core_type<tc>, window_params = [{transform_indices = @transform_0, window_bounds = array<i64: 8, 32>}, {transform_indices = @transform_1, window_bounds = array<i64: 8, 32>}, {pipeline_mode = #tpu.pipeline_mode<synchronous>, transform_indices = @transform_2, window_bounds = array<i64: 32, 32>}, {pipeline_mode = #tpu.pipeline_mode<synchronous>, transform_indices = @transform_3, window_bounds = array<i64: 32, 32>}, {pipeline_mode = #tpu.pipeline_mode<synchronous>, transform_indices = @transform_4, window_bounds = array<i64: 32, 32>}, {pipeline_mode = #tpu.pipeline_mode<synchronous>, transform_indices = @transform_5, window_bounds = array<i64: 1, 32>}, {pipeline_mode = #tpu.pipeline_mode<synchronous>, transform_indices = @transform_6, window_bounds = array<i64: 1, 32>}, {pipeline_mode = #tpu.pipeline_mode<synchronous>, transform_indices = @transform_7, window_bounds = array<i64: 1, 32>}, {pipeline_mode = #tpu.pipeline_mode<synchronous>, transform_indices = @transform_8, window_bounds = array<i64: 32, 32>}, {pipeline_mode = #tpu.pipeline_mode<synchronous>, transform_indices = @transform_9, window_bounds = array<i64: 1, 32>}, {pipeline_mode = #tpu.pipeline_mode<synchronous>, transform_indices = @transform_10, window_bounds = array<i64: 1, 32>}, {pipeline_mode = #tpu.pipeline_mode<synchronous>, transform_indices = @transform_11, window_bounds = array<i64: 1, 32>}, {pipeline_mode = #tpu.pipeline_mode<synchronous>, transform_indices = @transform_12, window_bounds = array<i64: 32, 128>}, {pipeline_mode = #tpu.pipeline_mode<synchronous>, transform_indices = @transform_13, window_bounds = array<i64: 1, 128>}, {pipeline_mode = #tpu.pipeline_mode<synchronous>, transform_indices = @transform_14, window_bounds = array<i64: 128, 32>}, {pipeline_mode = #tpu.pipeline_mode<synchronous>, transform_indices = @transform_15, window_bounds = array<i64: 1, 32>}, {pipeline_mode = #tpu.pipeline_mode<synchronous>, transform_indices = @transform_16, window_bounds = array<i64: 1, 32>}, {pipeline_mode = #tpu.pipeline_mode<synchronous>, transform_indices = @transform_17, window_bounds = array<i64: 1, 32>}, {transform_indices = @transform_18, window_bounds = array<i64: 8, 32>}]} {
    %c0 = arith.constant 0 : index
    %c0_0 = arith.constant 0 : index
    %0 = vector.load %arg2[%c0, %c0_0] : memref<8x32xf32, #tpu.memory_space<vmem>>, vector<8x32xf32>
    %c0_i32 = arith.constant 0 : i32
    %1 = arith.cmpi eq, %arg1, %c0_i32 : i32
    %2 = arith.extui %1 : i1 to i32
    %c0_i32_1 = arith.constant 0 : i32
    %3 = arith.cmpi ne, %2, %c0_i32_1 : i32
    scf.if %3 {
      %c0_69 = arith.constant 0 : index
      %c0_70 = arith.constant 0 : index
      %149 = vector.load %arg3[%c0_69, %c0_70] : memref<8x32xbf16, #tpu.memory_space<vmem>>, vector<8x32xbf16>
      %c0_71 = arith.constant 0 : index
      %c0_72 = arith.constant 0 : index
      %150 = vector.load %arg5[%c0_71, %c0_72] : memref<32x32xbf16, #tpu.memory_space<vmem>>, vector<32x32xbf16>
      %cst_73 = arith.constant dense<0.000000e+00> : vector<8x32xf32>
      %151 = tpu.matmul %149, %150, %cst_73 {dimension_numbers = #tpu.dot_dimension_numbers<[1], [0], [0], [1], [0, 0, 1, 1], [], []>} : vector<8x32xbf16>, vector<32x32xbf16>, vector<8x32xf32> -> vector<8x32xf32>
      %c0_74 = arith.constant 0 : index
      %c0_75 = arith.constant 0 : index
      %152 = vector.load %arg8[%c0_74, %c0_75] : memref<1x32xf32, #tpu.memory_space<vmem>>, vector<1x32xf32>
      %153 = vector.broadcast %152 : vector<1x32xf32> to vector<8x32xf32>
      %154 = arith.addf %151, %153 : vector<8x32xf32>
      %155 = arith.truncf %154 : vector<8x32xf32> to vector<8x32xbf16>
      %c0_76 = arith.constant 0 : index
      %c0_77 = arith.constant 0 : index
      %156 = vector.load %arg21[%c0_76, %c0_77] : memref<8x32xbf16, #tpu.memory_space<vmem>>, vector<8x32xbf16>
      tpu.vector_store %arg21[%c0_76, %c0_77], %155 {strides = array<i32>} : memref<8x32xbf16, #tpu.memory_space<vmem>>, vector<8x32xbf16>,
      %c0_78 = arith.constant 0 : index
      %c0_79 = arith.constant 0 : index
      %157 = vector.load %arg6[%c0_78, %c0_79] : memref<32x32xbf16, #tpu.memory_space<vmem>>, vector<32x32xbf16>
      %cst_80 = arith.constant dense<0.000000e+00> : vector<8x32xf32>
      %158 = tpu.matmul %149, %157, %cst_80 {dimension_numbers = #tpu.dot_dimension_numbers<[1], [0], [0], [1], [0, 0, 1, 1], [], []>} : vector<8x32xbf16>, vector<32x32xbf16>, vector<8x32xf32> -> vector<8x32xf32>
      %c0_81 = arith.constant 0 : index
      %c0_82 = arith.constant 0 : index
      %159 = vector.load %arg9[%c0_81, %c0_82] : memref<1x32xf32, #tpu.memory_space<vmem>>, vector<1x32xf32>
      %160 = vector.broadcast %159 : vector<1x32xf32> to vector<8x32xf32>
      %161 = arith.addf %158, %160 : vector<8x32xf32>
      %162 = arith.truncf %161 : vector<8x32xf32> to vector<8x32xbf16>
      %c0_83 = arith.constant 0 : index
      %c0_84 = arith.constant 0 : index
      %163 = vector.load %arg22[%c0_83, %c0_84] : memref<8x32xbf16, #tpu.memory_space<vmem>>, vector<8x32xbf16>
      tpu.vector_store %arg22[%c0_83, %c0_84], %162 {strides = array<i32>} : memref<8x32xbf16, #tpu.memory_space<vmem>>, vector<8x32xbf16>,
    } else {
    }
    %4 = arith.truncf %0 : vector<8x32xf32> to vector<8x32xbf16>
    %c0_2 = arith.constant 0 : index
    %c0_3 = arith.constant 0 : index
    %5 = vector.load %arg4[%c0_2, %c0_3] : memref<32x32xbf16, #tpu.memory_space<vmem>>, vector<32x32xbf16>
    %cst = arith.constant dense<0.000000e+00> : vector<8x32xf32>
    %6 = tpu.matmul %4, %5, %cst {dimension_numbers = #tpu.dot_dimension_numbers<[1], [0], [0], [1], [0, 0, 1, 1], [], []>} : vector<8x32xbf16>, vector<32x32xbf16>, vector<8x32xf32> -> vector<8x32xf32>
    %c0_4 = arith.constant 0 : index
    %c0_5 = arith.constant 0 : index
    %7 = vector.load %arg7[%c0_4, %c0_5] : memref<1x32xf32, #tpu.memory_space<vmem>>, vector<1x32xf32>
    %8 = vector.broadcast %7 : vector<1x32xf32> to vector<8x32xf32>
    %9 = arith.addf %6, %8 : vector<8x32xf32>
    %10 = arith.truncf %9 : vector<8x32xf32> to vector<8x32xbf16>
    %c0_6 = arith.constant 0 : index
    %c0_7 = arith.constant 0 : index
    %11 = vector.load %arg21[%c0_6, %c0_7] : memref<8x32xbf16, #tpu.memory_space<vmem>>, vector<8x32xbf16>
    %c0_8 = arith.constant 0 : index
    %c0_9 = arith.constant 0 : index
    %12 = vector.load %arg22[%c0_8, %c0_9] : memref<8x32xbf16, #tpu.memory_space<vmem>>, vector<8x32xbf16>
    %13 = vector.extract_strided_slice %10 {offsets = [0, 0], sizes = [8, 8], strides = [1, 1]} : vector<8x32xbf16> to vector<8x8xbf16>
    %14 = vector.extract_strided_slice %11 {offsets = [0, 0], sizes = [8, 8], strides = [1, 1]} : vector<8x32xbf16> to vector<8x8xbf16>
    %15 = vector.extract_strided_slice %12 {offsets = [0, 0], sizes = [8, 8], strides = [1, 1]} : vector<8x32xbf16> to vector<8x8xbf16>
    "tpu.trace_start"() <{level = 10 : i32, message = "qd,kd->qk"}> : () -> ()
    %cst_10 = arith.constant dense<0.000000e+00> : vector<8x8xf32>
    %16 = tpu.matmul %13, %14, %cst_10 {dimension_numbers = #tpu.dot_dimension_numbers<[1], [1], [0], [0], [0, 0, 1, 0], [], []>} : vector<8x8xbf16>, vector<8x8xbf16>, vector<8x8xf32> -> vector<8x8xf32>
    "tpu.trace_stop"() : () -> ()
    %cst_11 = arith.constant dense<0xFF800000> : vector<8xf32>
    %17 = vector.multi_reduction <maximumf>, %16, %cst_11 [1] : vector<8x8xf32> to vector<8xf32>
    %18 = vector.shape_cast %17 : vector<8xf32> to vector<8x1xf32>
    %19 = vector.broadcast %18 : vector<8x1xf32> to vector<8x8xf32>
    %20 = arith.subf %16, %19 : vector<8x8xf32>
    %21 = math.exp %20 : vector<8x8xf32>
    %cst_12 = arith.constant dense<0.000000e+00> : vector<8xf32>
    %22 = vector.multi_reduction <add>, %21, %cst_12 [1] : vector<8x8xf32> to vector<8xf32>
    %23 = vector.shape_cast %22 : vector<8xf32> to vector<8x1xf32>
    %24 = tpu.reciprocal %23 {approx = true} : vector<8x1xf32> -> vector<8x1xf32>
    %25 = vector.broadcast %24 : vector<8x1xf32> to vector<8x8xf32>
    %26 = arith.mulf %21, %25 : vector<8x8xf32>
    %27 = arith.truncf %26 : vector<8x8xf32> to vector<8x8xbf16>
    %cst_13 = arith.constant dense<0.000000e+00> : vector<8x8xf32>
    %28 = tpu.matmul %27, %15, %cst_13 {dimension_numbers = #tpu.dot_dimension_numbers<[1], [0], [0], [1], [0, 0, 1, 1], [], []>} : vector<8x8xbf16>, vector<8x8xbf16>, vector<8x8xf32> -> vector<8x8xf32>
    %c0_14 = arith.constant 0 : index
    %c0_15 = arith.constant 0 : index
    %29 = vector.load %arg23[%c0_14, %c0_15] : memref<8x32xf32, #tpu.memory_space<vmem>>, vector<8x8xf32>
    tpu.vector_store %arg23[%c0_14, %c0_15], %28 {strides = array<i32>} : memref<8x32xf32, #tpu.memory_space<vmem>>, vector<8x8xf32>,
    %30 = vector.extract_strided_slice %10 {offsets = [0, 8], sizes = [8, 8], strides = [1, 1]} : vector<8x32xbf16> to vector<8x8xbf16>
    %31 = vector.extract_strided_slice %11 {offsets = [0, 8], sizes = [8, 8], strides = [1, 1]} : vector<8x32xbf16> to vector<8x8xbf16>
    %32 = vector.extract_strided_slice %12 {offsets = [0, 8], sizes = [8, 8], strides = [1, 1]} : vector<8x32xbf16> to vector<8x8xbf16>
    "tpu.trace_start"() <{level = 10 : i32, message = "qd,kd->qk"}> : () -> ()
    %cst_16 = arith.constant dense<0.000000e+00> : vector<8x8xf32>
    %33 = tpu.matmul %30, %31, %cst_16 {dimension_numbers = #tpu.dot_dimension_numbers<[1], [1], [0], [0], [0, 0, 1, 0], [], []>} : vector<8x8xbf16>, vector<8x8xbf16>, vector<8x8xf32> -> vector<8x8xf32>
    "tpu.trace_stop"() : () -> ()
    %cst_17 = arith.constant dense<0xFF800000> : vector<8xf32>
    %34 = vector.multi_reduction <maximumf>, %33, %cst_17 [1] : vector<8x8xf32> to vector<8xf32>
    %35 = vector.shape_cast %34 : vector<8xf32> to vector<8x1xf32>
    %36 = vector.broadcast %35 : vector<8x1xf32> to vector<8x8xf32>
    %37 = arith.subf %33, %36 : vector<8x8xf32>
    %38 = math.exp %37 : vector<8x8xf32>
    %cst_18 = arith.constant dense<0.000000e+00> : vector<8xf32>
    %39 = vector.multi_reduction <add>, %38, %cst_18 [1] : vector<8x8xf32> to vector<8xf32>
    %40 = vector.shape_cast %39 : vector<8xf32> to vector<8x1xf32>
    %41 = tpu.reciprocal %40 {approx = true} : vector<8x1xf32> -> vector<8x1xf32>
    %42 = vector.broadcast %41 : vector<8x1xf32> to vector<8x8xf32>
    %43 = arith.mulf %38, %42 : vector<8x8xf32>
    %44 = arith.truncf %43 : vector<8x8xf32> to vector<8x8xbf16>
    %cst_19 = arith.constant dense<0.000000e+00> : vector<8x8xf32>
    %45 = tpu.matmul %44, %32, %cst_19 {dimension_numbers = #tpu.dot_dimension_numbers<[1], [0], [0], [1], [0, 0, 1, 1], [], []>} : vector<8x8xbf16>, vector<8x8xbf16>, vector<8x8xf32> -> vector<8x8xf32>
    %c0_20 = arith.constant 0 : index
    %c8 = arith.constant 8 : index
    %46 = vector.load %arg23[%c0_20, %c8] : memref<8x32xf32, #tpu.memory_space<vmem>>, vector<8x8xf32>
    tpu.vector_store %arg23[%c0_20, %c8], %45 {strides = array<i32>} : memref<8x32xf32, #tpu.memory_space<vmem>>, vector<8x8xf32>,
    %47 = vector.extract_strided_slice %10 {offsets = [0, 16], sizes = [8, 8], strides = [1, 1]} : vector<8x32xbf16> to vector<8x8xbf16>
    %48 = vector.extract_strided_slice %11 {offsets = [0, 16], sizes = [8, 8], strides = [1, 1]} : vector<8x32xbf16> to vector<8x8xbf16>
    %49 = vector.extract_strided_slice %12 {offsets = [0, 16], sizes = [8, 8], strides = [1, 1]} : vector<8x32xbf16> to vector<8x8xbf16>
    "tpu.trace_start"() <{level = 10 : i32, message = "qd,kd->qk"}> : () -> ()
    %cst_21 = arith.constant dense<0.000000e+00> : vector<8x8xf32>
    %50 = tpu.matmul %47, %48, %cst_21 {dimension_numbers = #tpu.dot_dimension_numbers<[1], [1], [0], [0], [0, 0, 1, 0], [], []>} : vector<8x8xbf16>, vector<8x8xbf16>, vector<8x8xf32> -> vector<8x8xf32>
    "tpu.trace_stop"() : () -> ()
    %cst_22 = arith.constant dense<0xFF800000> : vector<8xf32>
    %51 = vector.multi_reduction <maximumf>, %50, %cst_22 [1] : vector<8x8xf32> to vector<8xf32>
    %52 = vector.shape_cast %51 : vector<8xf32> to vector<8x1xf32>
    %53 = vector.broadcast %52 : vector<8x1xf32> to vector<8x8xf32>
    %54 = arith.subf %50, %53 : vector<8x8xf32>
    %55 = math.exp %54 : vector<8x8xf32>
    %cst_23 = arith.constant dense<0.000000e+00> : vector<8xf32>
    %56 = vector.multi_reduction <add>, %55, %cst_23 [1] : vector<8x8xf32> to vector<8xf32>
    %57 = vector.shape_cast %56 : vector<8xf32> to vector<8x1xf32>
    %58 = tpu.reciprocal %57 {approx = true} : vector<8x1xf32> -> vector<8x1xf32>
    %59 = vector.broadcast %58 : vector<8x1xf32> to vector<8x8xf32>
    %60 = arith.mulf %55, %59 : vector<8x8xf32>
    %61 = arith.truncf %60 : vector<8x8xf32> to vector<8x8xbf16>
    %cst_24 = arith.constant dense<0.000000e+00> : vector<8x8xf32>
    %62 = tpu.matmul %61, %49, %cst_24 {dimension_numbers = #tpu.dot_dimension_numbers<[1], [0], [0], [1], [0, 0, 1, 1], [], []>} : vector<8x8xbf16>, vector<8x8xbf16>, vector<8x8xf32> -> vector<8x8xf32>
    %c0_25 = arith.constant 0 : index
    %c16 = arith.constant 16 : index
    %63 = vector.load %arg23[%c0_25, %c16] : memref<8x32xf32, #tpu.memory_space<vmem>>, vector<8x8xf32>
    tpu.vector_store %arg23[%c0_25, %c16], %62 {strides = array<i32>} : memref<8x32xf32, #tpu.memory_space<vmem>>, vector<8x8xf32>,
    %64 = vector.extract_strided_slice %10 {offsets = [0, 24], sizes = [8, 8], strides = [1, 1]} : vector<8x32xbf16> to vector<8x8xbf16>
    %65 = vector.extract_strided_slice %11 {offsets = [0, 24], sizes = [8, 8], strides = [1, 1]} : vector<8x32xbf16> to vector<8x8xbf16>
    %66 = vector.extract_strided_slice %12 {offsets = [0, 24], sizes = [8, 8], strides = [1, 1]} : vector<8x32xbf16> to vector<8x8xbf16>
    "tpu.trace_start"() <{level = 10 : i32, message = "qd,kd->qk"}> : () -> ()
    %cst_26 = arith.constant dense<0.000000e+00> : vector<8x8xf32>
    %67 = tpu.matmul %64, %65, %cst_26 {dimension_numbers = #tpu.dot_dimension_numbers<[1], [1], [0], [0], [0, 0, 1, 0], [], []>} : vector<8x8xbf16>, vector<8x8xbf16>, vector<8x8xf32> -> vector<8x8xf32>
    "tpu.trace_stop"() : () -> ()
    %cst_27 = arith.constant dense<0xFF800000> : vector<8xf32>
    %68 = vector.multi_reduction <maximumf>, %67, %cst_27 [1] : vector<8x8xf32> to vector<8xf32>
    %69 = vector.shape_cast %68 : vector<8xf32> to vector<8x1xf32>
    %70 = vector.broadcast %69 : vector<8x1xf32> to vector<8x8xf32>
    %71 = arith.subf %67, %70 : vector<8x8xf32>
    %72 = math.exp %71 : vector<8x8xf32>
    %cst_28 = arith.constant dense<0.000000e+00> : vector<8xf32>
    %73 = vector.multi_reduction <add>, %72, %cst_28 [1] : vector<8x8xf32> to vector<8xf32>
    %74 = vector.shape_cast %73 : vector<8xf32> to vector<8x1xf32>
    %75 = tpu.reciprocal %74 {approx = true} : vector<8x1xf32> -> vector<8x1xf32>
    %76 = vector.broadcast %75 : vector<8x1xf32> to vector<8x8xf32>
    %77 = arith.mulf %72, %76 : vector<8x8xf32>
    %78 = arith.truncf %77 : vector<8x8xf32> to vector<8x8xbf16>
    %cst_29 = arith.constant dense<0.000000e+00> : vector<8x8xf32>
    %79 = tpu.matmul %78, %66, %cst_29 {dimension_numbers = #tpu.dot_dimension_numbers<[1], [0], [0], [1], [0, 0, 1, 1], [], []>} : vector<8x8xbf16>, vector<8x8xbf16>, vector<8x8xf32> -> vector<8x8xf32>
    %c0_30 = arith.constant 0 : index
    %c24 = arith.constant 24 : index
    %80 = vector.load %arg23[%c0_30, %c24] : memref<8x32xf32, #tpu.memory_space<vmem>>, vector<8x8xf32>
    tpu.vector_store %arg23[%c0_30, %c24], %79 {strides = array<i32>} : memref<8x32xf32, #tpu.memory_space<vmem>>, vector<8x8xf32>,
    %c0_31 = arith.constant 0 : index
    %c0_32 = arith.constant 0 : index
    %81 = vector.load %arg23[%c0_31, %c0_32] : memref<8x32xf32, #tpu.memory_space<vmem>>, vector<8x32xf32>
    %82 = arith.truncf %81 : vector<8x32xf32> to vector<8x32xbf16>
    %c0_33 = arith.constant 0 : index
    %c0_34 = arith.constant 0 : index
    %83 = vector.load %arg10[%c0_33, %c0_34] : memref<32x32xbf16, #tpu.memory_space<vmem>>, vector<32x32xbf16>
    %cst_35 = arith.constant dense<0.000000e+00> : vector<8x32xf32>
    %84 = tpu.matmul %82, %83, %cst_35 {dimension_numbers = #tpu.dot_dimension_numbers<[1], [0], [0], [1], [0, 0, 1, 1], [], []>} : vector<8x32xbf16>, vector<32x32xbf16>, vector<8x32xf32> -> vector<8x32xf32>
    %c0_36 = arith.constant 0 : index
    %c0_37 = arith.constant 0 : index
    %85 = vector.load %arg11[%c0_36, %c0_37] : memref<1x32xf32, #tpu.memory_space<vmem>>, vector<1x32xf32>
    %86 = vector.broadcast %85 : vector<1x32xf32> to vector<8x32xf32>
    %87 = arith.addf %84, %86 : vector<8x32xf32>
    %88 = arith.addf %0, %87 : vector<8x32xf32>
    %c0_38 = arith.constant 0 : index
    %c0_39 = arith.constant 0 : index
    %89 = vector.load %arg12[%c0_38, %c0_39] : memref<1x32xf32, #tpu.memory_space<vmem>>, vector<1x32xf32>
    %c0_40 = arith.constant 0 : index
    %c0_41 = arith.constant 0 : index
    %90 = vector.load %arg13[%c0_40, %c0_41] : memref<1x32xf32, #tpu.memory_space<vmem>>, vector<1x32xf32>
    %cst_42 = arith.constant dense<0.000000e+00> : vector<8xf32>
    %91 = vector.multi_reduction <add>, %88, %cst_42 [1] : vector<8x32xf32> to vector<8xf32>
    %92 = vector.shape_cast %91 : vector<8xf32> to vector<8x1xf32>
    %cst_43 = arith.constant 3.200000e+01 : f32
    %93 = vector.broadcast %cst_43 : f32 to vector<8x1xf32>
    %94 = arith.divf %92, %93 : vector<8x1xf32>
    %95 = vector.broadcast %94 : vector<8x1xf32> to vector<8x32xf32>
    %96 = arith.subf %88, %95 : vector<8x32xf32>
    %97 = arith.mulf %96, %96 : vector<8x32xf32>
    %cst_44 = arith.constant dense<0.000000e+00> : vector<8xf32>
    %98 = vector.multi_reduction <add>, %97, %cst_44 [1] : vector<8x32xf32> to vector<8xf32>
    %99 = vector.shape_cast %98 : vector<8xf32> to vector<8x1xf32>
    %cst_45 = arith.constant 3.200000e+01 : f32
    %100 = vector.broadcast %cst_45 : f32 to vector<8x1xf32>
    %101 = arith.divf %99, %100 : vector<8x1xf32>
    %cst_46 = arith.constant 9.99999974E-6 : f32
    %102 = vector.broadcast %cst_46 : f32 to vector<8x1xf32>
    %103 = arith.addf %101, %102 : vector<8x1xf32>
    %104 = math.rsqrt %103 : vector<8x1xf32>
    %105 = vector.broadcast %104 : vector<8x1xf32> to vector<8x32xf32>
    %106 = arith.mulf %96, %105 : vector<8x32xf32>
    %107 = vector.broadcast %89 : vector<1x32xf32> to vector<8x32xf32>
    %108 = arith.mulf %106, %107 : vector<8x32xf32>
    %109 = vector.broadcast %90 : vector<1x32xf32> to vector<8x32xf32>
    %110 = arith.addf %108, %109 : vector<8x32xf32>
    %111 = arith.truncf %110 : vector<8x32xf32> to vector<8x32xbf16>
    %c0_47 = arith.constant 0 : index
    %c0_48 = arith.constant 0 : index
    %112 = vector.load %arg14[%c0_47, %c0_48] : memref<32x128xbf16, #tpu.memory_space<vmem>>, vector<32x128xbf16>
    %cst_49 = arith.constant dense<0.000000e+00> : vector<8x128xf32>
    %113 = tpu.matmul %111, %112, %cst_49 {dimension_numbers = #tpu.dot_dimension_numbers<[1], [0], [0], [1], [0, 0, 1, 1], [], []>} : vector<8x32xbf16>, vector<32x128xbf16>, vector<8x128xf32> -> vector<8x128xf32>
    %c0_50 = arith.constant 0 : index
    %c0_51 = arith.constant 0 : index
    %114 = vector.load %arg15[%c0_50, %c0_51] : memref<1x128xf32, #tpu.memory_space<vmem>>, vector<1x128xf32>
    %115 = vector.broadcast %114 : vector<1x128xf32> to vector<8x128xf32>
    %116 = arith.addf %113, %115 : vector<8x128xf32>
    %cst_52 = arith.constant 0.000000e+00 : f32
    %117 = vector.broadcast %cst_52 : f32 to vector<8x128xf32>
    %118 = arith.maximumf %116, %117 : vector<8x128xf32>
    %119 = arith.truncf %118 : vector<8x128xf32> to vector<8x128xbf16>
    %c0_53 = arith.constant 0 : index
    %c0_54 = arith.constant 0 : index
    %120 = vector.load %arg16[%c0_53, %c0_54] : memref<128x32xbf16, #tpu.memory_space<vmem>>, vector<128x32xbf16>
    %cst_55 = arith.constant dense<0.000000e+00> : vector<8x32xf32>
    %121 = tpu.matmul %119, %120, %cst_55 {dimension_numbers = #tpu.dot_dimension_numbers<[1], [0], [0], [1], [0, 0, 1, 1], [], []>} : vector<8x128xbf16>, vector<128x32xbf16>, vector<8x32xf32> -> vector<8x32xf32>
    %c0_56 = arith.constant 0 : index
    %c0_57 = arith.constant 0 : index
    %122 = vector.load %arg17[%c0_56, %c0_57] : memref<1x32xf32, #tpu.memory_space<vmem>>, vector<1x32xf32>
    %123 = vector.broadcast %122 : vector<1x32xf32> to vector<8x32xf32>
    %124 = arith.addf %121, %123 : vector<8x32xf32>
    %125 = arith.addf %110, %124 : vector<8x32xf32>
    %c0_58 = arith.constant 0 : index
    %c0_59 = arith.constant 0 : index
    %126 = vector.load %arg18[%c0_58, %c0_59] : memref<1x32xf32, #tpu.memory_space<vmem>>, vector<1x32xf32>
    %c0_60 = arith.constant 0 : index
    %c0_61 = arith.constant 0 : index
    %127 = vector.load %arg19[%c0_60, %c0_61] : memref<1x32xf32, #tpu.memory_space<vmem>>, vector<1x32xf32>
    %cst_62 = arith.constant dense<0.000000e+00> : vector<8xf32>
    %128 = vector.multi_reduction <add>, %125, %cst_62 [1] : vector<8x32xf32> to vector<8xf32>
    %129 = vector.shape_cast %128 : vector<8xf32> to vector<8x1xf32>
    %cst_63 = arith.constant 3.200000e+01 : f32
    %130 = vector.broadcast %cst_63 : f32 to vector<8x1xf32>
    %131 = arith.divf %129, %130 : vector<8x1xf32>
    %132 = vector.broadcast %131 : vector<8x1xf32> to vector<8x32xf32>
    %133 = arith.subf %125, %132 : vector<8x32xf32>
    %134 = arith.mulf %133, %133 : vector<8x32xf32>
    %cst_64 = arith.constant dense<0.000000e+00> : vector<8xf32>
    %135 = vector.multi_reduction <add>, %134, %cst_64 [1] : vector<8x32xf32> to vector<8xf32>
    %136 = vector.shape_cast %135 : vector<8xf32> to vector<8x1xf32>
    %cst_65 = arith.constant 3.200000e+01 : f32
    %137 = vector.broadcast %cst_65 : f32 to vector<8x1xf32>
    %138 = arith.divf %136, %137 : vector<8x1xf32>
    %cst_66 = arith.constant 9.99999974E-6 : f32
    %139 = vector.broadcast %cst_66 : f32 to vector<8x1xf32>
    %140 = arith.addf %138, %139 : vector<8x1xf32>
    %141 = math.rsqrt %140 : vector<8x1xf32>
    %142 = vector.broadcast %141 : vector<8x1xf32> to vector<8x32xf32>
    %143 = arith.mulf %133, %142 : vector<8x32xf32>
    %144 = vector.broadcast %126 : vector<1x32xf32> to vector<8x32xf32>
    %145 = arith.mulf %143, %144 : vector<8x32xf32>
    %146 = vector.broadcast %127 : vector<1x32xf32> to vector<8x32xf32>
    %147 = arith.addf %145, %146 : vector<8x32xf32>
    %c0_67 = arith.constant 0 : index
    %c0_68 = arith.constant 0 : index
    %148 = vector.load %arg20[%c0_67, %c0_68] : memref<8x32xf32, #tpu.memory_space<vmem>>, vector<8x32xf32>
    tpu.vector_store %arg20[%c0_67, %c0_68], %147 {strides = array<i32>} : memref<8x32xf32, #tpu.memory_space<vmem>>, vector<8x32xf32>,
    return
  }
  func.func @transform_0(%arg0: i32, %arg1: i32) -> (i32, i32) {
    %c1_i32 = arith.constant 1 : i32
    %0 = arith.muli %arg0, %c1_i32 : i32
    %1 = arith.addi %0, %arg1 : i32
    %c0_i32 = arith.constant 0 : i32
    %c0_i32_0 = arith.constant 0 : i32
    return %1, %c0_i32 : i32, i32
  }
  func.func @transform_1(%arg0: i32, %arg1: i32) -> (i32, i32) {
    %c0_i32 = arith.constant 0 : i32
    %c0_i32_0 = arith.constant 0 : i32
    return %arg0, %c0_i32 : i32, i32
  }
  func.func @transform_2(%arg0: i32, %arg1: i32) -> (i32, i32) {
    %c0_i32 = arith.constant 0 : i32
    %c0_i32_0 = arith.constant 0 : i32
    %c0_i32_1 = arith.constant 0 : i32
    return %c0_i32, %c0_i32_0 : i32, i32
  }
  func.func @transform_3(%arg0: i32, %arg1: i32) -> (i32, i32) {
    %c0_i32 = arith.constant 0 : i32
    %c0_i32_0 = arith.constant 0 : i32
    %c0_i32_1 = arith.constant 0 : i32
    return %c0_i32, %c0_i32_0 : i32, i32
  }
  func.func @transform_4(%arg0: i32, %arg1: i32) -> (i32, i32) {
    %c0_i32 = arith.constant 0 : i32
    %c0_i32_0 = arith.constant 0 : i32
    %c0_i32_1 = arith.constant 0 : i32
    return %c0_i32, %c0_i32_0 : i32, i32
  }
  func.func @transform_5(%arg0: i32, %arg1: i32) -> (i32, i32) {
    %c0_i32 = arith.constant 0 : i32
    %c0_i32_0 = arith.constant 0 : i32
    %c0_i32_1 = arith.constant 0 : i32
    return %c0_i32, %c0_i32_0 : i32, i32
  }
  func.func @transform_6(%arg0: i32, %arg1: i32) -> (i32, i32) {
    %c0_i32 = arith.constant 0 : i32
    %c0_i32_0 = arith.constant 0 : i32
    %c0_i32_1 = arith.constant 0 : i32
    return %c0_i32, %c0_i32_0 : i32, i32
  }
  func.func @transform_7(%arg0: i32, %arg1: i32) -> (i32, i32) {
    %c0_i32 = arith.constant 0 : i32
    %c0_i32_0 = arith.constant 0 : i32
    %c0_i32_1 = arith.constant 0 : i32
    return %c0_i32, %c0_i32_0 : i32, i32
  }
  func.func @transform_8(%arg0: i32, %arg1: i32) -> (i32, i32) {
    %c0_i32 = arith.constant 0 : i32
    %c0_i32_0 = arith.constant 0 : i32
    %c0_i32_1 = arith.constant 0 : i32
    return %c0_i32, %c0_i32_0 : i32, i32
  }
  func.func @transform_9(%arg0: i32, %arg1: i32) -> (i32, i32) {
    %c0_i32 = arith.constant 0 : i32
    %c0_i32_0 = arith.constant 0 : i32
    %c0_i32_1 = arith.constant 0 : i32
    return %c0_i32, %c0_i32_0 : i32, i32
  }
  func.func @transform_10(%arg0: i32, %arg1: i32) -> (i32, i32) {
    %c0_i32 = arith.constant 0 : i32
    %c0_i32_0 = arith.constant 0 : i32
    %c0_i32_1 = arith.constant 0 : i32
    return %c0_i32, %c0_i32_0 : i32, i32
  }
  func.func @transform_11(%arg0: i32, %arg1: i32) -> (i32, i32) {
    %c0_i32 = arith.constant 0 : i32
    %c0_i32_0 = arith.constant 0 : i32
    %c0_i32_1 = arith.constant 0 : i32
    return %c0_i32, %c0_i32_0 : i32, i32
  }
  func.func @transform_12(%arg0: i32, %arg1: i32) -> (i32, i32) {
    %c0_i32 = arith.constant 0 : i32
    %c0_i32_0 = arith.constant 0 : i32
    %c0_i32_1 = arith.constant 0 : i32
    return %c0_i32, %c0_i32_0 : i32, i32
  }
  func.func @transform_13(%arg0: i32, %arg1: i32) -> (i32, i32) {
    %c0_i32 = arith.constant 0 : i32
    %c0_i32_0 = arith.constant 0 : i32
    %c0_i32_1 = arith.constant 0 : i32
    return %c0_i32, %c0_i32_0 : i32, i32
  }
  func.func @transform_14(%arg0: i32, %arg1: i32) -> (i32, i32) {
    %c0_i32 = arith.constant 0 : i32
    %c0_i32_0 = arith.constant 0 : i32
    %c0_i32_1 = arith.constant 0 : i32
    return %c0_i32, %c0_i32_0 : i32, i32
  }
  func.func @transform_15(%arg0: i32, %arg1: i32) -> (i32, i32) {
    %c0_i32 = arith.constant 0 : i32
    %c0_i32_0 = arith.constant 0 : i32
    %c0_i32_1 = arith.constant 0 : i32
    return %c0_i32, %c0_i32_0 : i32, i32
  }
  func.func @transform_16(%arg0: i32, %arg1: i32) -> (i32, i32) {
    %c0_i32 = arith.constant 0 : i32
    %c0_i32_0 = arith.constant 0 : i32
    %c0_i32_1 = arith.constant 0 : i32
    return %c0_i32, %c0_i32_0 : i32, i32
  }
  func.func @transform_17(%arg0: i32, %arg1: i32) -> (i32, i32) {
    %c0_i32 = arith.constant 0 : i32
    %c0_i32_0 = arith.constant 0 : i32
    %c0_i32_1 = arith.constant 0 : i32
    return %c0_i32, %c0_i32_0 : i32, i32
  }
  func.func @transform_18(%arg0: i32, %arg1: i32) -> (i32, i32) {
    %c1_i32 = arith.constant 1 : i32
    %0 = arith.muli %arg0, %c1_i32 : i32
    %1 = arith.addi %0, %arg1 : i32
    %c0_i32 = arith.constant 0 : i32
    %c0_i32_0 = arith.constant 0 : i32
    return %1, %c0_i32 : i32, i32
  }
}

</mosaic_0001>

<bundles_post_ra>
// kernel: tpu_custom_call.1
= control target key start
LH: loop header
LB: loop body
LE: loop exit
PB: predicated region body
PF: predicated region fallthrough
CT: control target
= control target key end

     0   :  { %s4092_s0 = inlined_call_operand.hbm [shape: f32[16,32], index: 0, kind: input, shape index: {}]   ;;  %s4093_s1 = inlined_call_operand.hbm [shape: bf16[16,32], index: 1, kind: input, shape index: {}]   ;;  %s4094_s2 = inlined_call_operand.hbm [shape: bf16[32,32], index: 2, kind: input, shape index: {}]   ;;  %s4095_s3 = inlined_call_operand.hbm [shape: bf16[32,32], index: 3, kind: input, shape index: {}]   ;;  %s4096_s4 = inlined_call_operand.hbm [shape: bf16[32,32], index: 4, kind: input, shape index: {}]   ;;  %s4097_s5 = inlined_call_operand.hbm [shape: f32[1,32], index: 5, kind: input, shape index: {}]   ;;  %s4098_s6 = inlined_call_operand.hbm [shape: f32[1,32], index: 6, kind: input, shape index: {}]   ;;  %s4099_s7 = inlined_call_operand.hbm [shape: f32[1,32], index: 7, kind: input, shape index: {}]   ;;  %s4100_s8 = inlined_call_operand.hbm [shape: bf16[32,32], index: 8, kind: input, shape index: {}]   ;;  %s4101_s9 = inlined_call_operand.hbm [shape: f32[1,32], index: 9, kind: input, shape index: {}]   ;;  %s4102_s10 = inlined_call_operand.hbm [shape: f32[1,32], index: 10, kind: input, shape index: {}]   ;;  %s4103_s11 = inlined_call_operand.hbm [shape: f32[1,32], index: 11, kind: input, shape index: {}]   ;;  %s4104_s12 = inlined_call_operand.hbm [shape: bf16[32,128], index: 12, kind: input, shape index: {}]   ;;  %s4105_s13 = inlined_call_operand.hbm [shape: f32[1,128], index: 13, kind: input, shape index: {}]   ;;  %s4106_s14 = inlined_call_operand.hbm [shape: bf16[128,32], index: 14, kind: input, shape index: {}]   ;;  %s4107_s15 = inlined_call_operand.hbm [shape: f32[1,32], index: 15, kind: input, shape index: {}]   ;;  %s4108_s16 = inlined_call_operand.hbm [shape: f32[1,32], index: 16, kind: input, shape index: {}]   ;;  %s4109_s17 = inlined_call_operand.hbm [shape: f32[1,32], index: 17, kind: input, shape index: {}]   ;;  %s4110_s18 = inlined_call_operand.hbm [shape: f32[16,32], index: 18, kind: output, shape index: {}]  }
   0x1   :  { %4133 = sst [smem:[#allocation55_spill]] %s4092_s0 }
   0x2   :  { %4134 = sst [smem:[#allocation56_spill]] %s4093_s1 }
   0x3   :  { %4135 = sst [smem:[#allocation57_spill]] %s4094_s2 }
   0x4   :  { %4136 = sst [smem:[#allocation58_spill]] %s4095_s3 }
   0x5   :  { %4137 = sst [smem:[#allocation59_spill]] %s4096_s4 }
   0x6   :  { %4138 = sst [smem:[#allocation60_spill]] %s4097_s5 }
   0x7   :  { %4139 = sst [smem:[#allocation61_spill]] %s4098_s6 }
   0x8   :  { %4140 = sst [smem:[#allocation62_spill]] %s4099_s7 }
   0x9   :  { %4141 = sst [smem:[#allocation63_spill]] %s4100_s8 }
   0xa   :  { %4142 = sst [smem:[#allocation64_spill]] %s4101_s9 }
   0xb   :  { %4143 = sst [smem:[#allocation65_spill]] %s4102_s10 }
   0xc   :  { %4144 = sst [smem:[#allocation66_spill]] %s4109_s17 }
   0xd   :  { %4145 = sst [smem:[#allocation67_spill]] %s4110_s18 }
   0xe   :  { %23 = vsyncpa [#allocation6], 0 }
   0xf   :  { %25 = vsyncpa [#allocation6 + $0x1], 0 }
  0x10   :  { %26 = vsyncpa [#allocation9], 0 }
  0x11   :  { %28 = vsyncpa [#allocation9 + $0x1], 0 }
  0x12   :  { %29 = vsyncpa [#allocation12], 0 }
  0x13   :  { %30 = vsyncpa [#allocation15], 0 }
  0x14   :  { %31 = vsyncpa [#allocation18], 0 }
  0x15   :  { %32 = vsyncpa [#allocation21], 0 }
  0x16   :  { %33 = vsyncpa [#allocation24], 0 }
  0x17   :  { %34 = vsyncpa [#allocation27], 0 }
  0x18   :  { %35 = vsyncpa [#allocation30], 0 }
  0x19   :  { %36 = vsyncpa [#allocation33], 0 }
  0x1a   :  { %37 = vsyncpa [#allocation7], 0 }
  0x1b   :  { %39 = vsyncpa [#allocation7 + $0x1], 0  ;;  %s3387_s27 = smov 0   ;;  %s3389_s28 = smov 0  }
  0x1c   :  { %s3391_s29 = smov 0   ;;  %s3393_s30 = smov 0  }
  0x1d   :  { %s3395_s0 = smov 0   ;;  %s3397_s19 = smov 0  }
  0x1e LB: > { %4146 = sst [smem:[#allocation47_spill]] %s3241_s27  ;;  %s3418_s1 = sadd.s32 4294967295, %s3261_s19   ;;  %s3261_s19 = sphi %s3397_s19, %s45_s19   ;;  %s3257_s0 = sphi %s3395_s0, %s4222_s0   ;;  %s3253_s30 = sphi %s3393_s30, %s4218_s30   ;;  %s3249_s29 = sphi %s3391_s29, %s4221_s29   ;;  %s3245_s28 = sphi %s3389_s28, %s4216_s28   ;;  %s3241_s27 = sphi %s3387_s27, %s4220_s27  }
  0x1f   : > { %4147 = sst [smem:[#allocation48_spill]] %s3245_s28  ;;  %p2116_p0 = scmp.ge.s32.totalorder %s3261_s19, 1 }
  0x20   : > { %4148 = sst [smem:[#allocation49_spill]] %s3249_s29  ;;  %p4126_p1 = scmp.eq.s32.totalorder %s3418_s1, 0 }
  0x21   : > { %4149 = sst [smem:[#allocation50_spill]] %s3253_s30  ;;  %p480_p2 = scmp.lt.s32.totalorder %s3261_s19, 3 }
  0x22   : > { %4150 = sst [smem:[#allocation51_spill]] %s3257_s0  ;;  %s3263_s21 = smov [#allocation10]  }
  0x23   : > { %4151 = sst [smem:[#allocation52_spill]] %s3261_s19  ;;  %p3423_p3 = pnand %p2116_p0, %p480_p2 }
  0x24   : > { %4152 = sst [smem:[#allocation53_spill]] %s3418_s1  ;;  %s492_s22 = sshll.u32 %s3263_s21, 4  ;;  %s3427_s22 = int_to_ptr.vmem [resolvable:$true] %s492_s22 }
  0x25   : > { %s4153_s20 = scalar_select %p3423_p3, 1, 0 }
  0x26   : > { %p2423_p4 = pneg %p3423_p3  ;;  %s3264_s23 = smov [#allocation11]  }
  0x27   : > { %4154 = sst [smem:[#allocation54_spill]] %s4153_s20  ;;  %s505_s24 = sshll.u32 %s3264_s23, 4  ;;  %s3438_s24 = int_to_ptr.vmem [resolvable:$true] %s505_s24 }
  0x28   : > { %p3434_p6 = pnand %p2423_p4, %p4126_p1  ;;  %s3265_s25 = smov [#allocation14]  }
  0x29   : > { %s3440_s26 = sshll.u32 %s3265_s25, 4  ;;  %s4156_s30 = sld [smem:[#allocation57_spill]]  ;;  %s533_s26 = int_to_ptr.vmem [resolvable:$true] %s3440_s26 }
  0x2a   : > { %p3450_p8 = pneg %p3434_p6 }
  0x2f   : > { %s4157_s17 = smov %s4156_s30  ;;  %s2631_s27 = scalar_lea.hbm %s4156_s30, 256 }
  0x30   : > { %p2632_p7 = scmp.ne.s32.totalorder %s4157_s17, %s2631_s27  ;;  %p2638_p11 = scmp.lt.u32.totalorder %s2631_s27, %s4157_s17 }
  0x32   : > { %p2634_p9 = pnand %p3450_p8, %p2632_p7 }
  0x34   : > { %p2635_p10 = pneg %p2634_p9 }
  0x36   : > { %p2640_p12 = pnand %p2638_p11, %p2635_p10 }
  0x38   : > { %2643 = shalt.err (!%p2640_p12)
}
  0x39   : > { %s2644_s18 = scalar_lea.vmem %s3427_s22, 256  ;;  %p2652_p4 = scmp.lt.s32.totalorder %s3427_s22, %s3427_s22 }
  0x3a   : > { %p2645_p13 = scmp.ne.s32.totalorder %s3427_s22, %s2644_s18  ;;  %p2653_p5 = scmp.lt.s32.totalorder %s2644_s18, %s2644_s18 }
  0x3c   : > { %p2647_p0 = pnand %p2645_p13, %p3450_p8  ;;  %p2654_p7 = por %p2653_p5, %p2652_p4 }
  0x3e   : > { %p2648_p2 = pneg %p2647_p0 }
  0x40   : > { %p2655_p9 = pnand %p2654_p7, %p2648_p2 }
  0x42   : > { %2658 = shalt.err (!%p2655_p9)
}
  0x43   : > { %s4128_s28 = smov 64   ;;  %s3267_s27 = smov 4  }
  0x44   : > { %2426 = dma.hbm_to_vmem [thread:$0]  (!%p3434_p6), %s4157_s17, 256, %s3427_s22, [#allocation9], %s4128_s28, %s4128_s28, %s3267_s27  }
  0x45   : > { %s4159_s3 = sld [smem:[#allocation58_spill]] }
  0x4b   : > { %s2659_s25 = scalar_lea.hbm %s4159_s3, 256 }
  0x4c   : > { %p2660_p5 = scmp.ne.s32.totalorder %s4159_s3, %s2659_s25  ;;  %p2666_p12 = scmp.lt.u32.totalorder %s2659_s25, %s4159_s3 }
  0x4e   : > { %p2662_p10 = pnand %p2660_p5, %p3450_p8 }
  0x50   : > { %p2663_p11 = pneg %p2662_p10 }
  0x52   : > { %p2668_p13 = pnand %p2666_p12, %p2663_p11 }
  0x54   : > { %2671 = shalt.err (!%p2668_p13)
}
  0x55   : > { %s2672_s22 = scalar_lea.vmem %s3438_s24, 256  ;;  %p2680_p7 = scmp.lt.s32.totalorder %s3438_s24, %s3438_s24 }
  0x56   : > { %p2673_p0 = scmp.ne.s32.totalorder %s3438_s24, %s2672_s22  ;;  %p2681_p9 = scmp.lt.s32.totalorder %s2672_s22, %s2672_s22 }
  0x58   : > { %p2675_p2 = pnand %p2673_p0, %p3450_p8  ;;  %p2682_p5 = por %p2681_p9, %p2680_p7 }
  0x5a   : > { %p2676_p4 = pneg %p2675_p2 }
  0x5c   : > { %p2683_p10 = pnand %p2682_p5, %p2676_p4 }
  0x5e   : > { %2686 = shalt.err (!%p2683_p10)
}
  0x5f   : > { %2429 = dma.hbm_to_vmem [thread:$0]  (!%p3434_p6), %s4159_s3, 256, %s3438_s24, [#allocation12], %s4128_s28, %s4128_s28, %s3267_s27  }
  0x60   : > { %s4160_s5 = sld [smem:[#allocation60_spill]] }
  0x66   : > { %s2687_s20 = scalar_lea.hbm %s4160_s5, 16 }
  0x67   : > { %p2688_p11 = scmp.ne.s32.totalorder %s4160_s5, %s2687_s20  ;;  %p2694_p0 = scmp.lt.u32.totalorder %s2687_s20, %s4160_s5 }
  0x69   : > { %p2690_p12 = pnand %p2688_p11, %p3450_p8 }
  0x6b   : > { %p2691_p13 = pneg %p2690_p12 }
  0x6d   : > { %p2696_p2 = pnand %p2694_p0, %p2691_p13 }
  0x6f   : > { %2699 = shalt.err (!%p2696_p2)
}
  0x70   : > { %s2700_s22 = scalar_lea.vmem %s533_s26, 16  ;;  %s2707_s24 = scalar_lea.vmem %s533_s26, 32 }
  0x71   : > { %p2701_p4 = scmp.ne.s32.totalorder %s533_s26, %s2700_s22  ;;  %p2708_p5 = scmp.lt.s32.totalorder %s533_s26, %s533_s26 }
  0x72   : > { %p2709_p10 = scmp.lt.s32.totalorder %s2707_s24, %s2700_s22 }
  0x73   : > { %p2703_p7 = pnand %p2701_p4, %p3450_p8 }
  0x74   : > { %p2710_p1 = por %p2709_p10, %p2708_p5 }
  0x75   : > { %p2704_p9 = pneg %p2703_p7 }
  0x77   : > { %p2711_p3 = pnand %p2710_p1, %p2704_p9 }
  0x79   : > { %2714 = shalt.err (!%p2711_p3)
}
  0x7a   : > { %2435 = dma.hbm_to_vmem [thread:$0]  (!%p3434_p6), %s4160_s5, 16, %s533_s26, [#allocation15]  }
  0x7b   : > { %s3268_s19 = smov [#allocation17]   ;;  %s3269_s20 = smov [#allocation20]  }
  0x7c   : > { %s554_s30 = sshll.u32 %s3268_s19, 4  ;;  %s578_s21 = sshll.u32 %s3269_s20, 4  ;;  %s555_s30 = int_to_ptr.vmem [resolvable:$true] %s554_s30  ;;  %s579_s21 = int_to_ptr.vmem [resolvable:$true] %s578_s21 }
  0x7d   : > { %s4161_s7 = sld [smem:[#allocation62_spill]] }
  0x83   : > { %s2715_s18 = scalar_lea.hbm %s4161_s7, 16 }
  0x84   : > { %p2716_p1 = scmp.ne.s32.totalorder %s4161_s7, %s2715_s18  ;;  %p2722_p12 = scmp.lt.u32.totalorder %s2715_s18, %s4161_s7 }
  0x86   : > { %p2718_p3 = pnand %p2716_p1, %p3450_p8 }
  0x88   : > { %p2719_p11 = pneg %p2718_p3 }
  0x8a   : > { %p2724_p13 = pnand %p2722_p12, %p2719_p11 }
  0x8c   : > { %2727 = shalt.err (!%p2724_p13)
}
  0x8d   : > { %s2728_s26 = scalar_lea.vmem %s555_s30, 16  ;;  %s2735_s0 = scalar_lea.vmem %s555_s30, 32 }
  0x8e   : > { %p2729_p0 = scmp.ne.s32.totalorder %s555_s30, %s2728_s26  ;;  %p2736_p7 = scmp.lt.s32.totalorder %s555_s30, %s555_s30 }
  0x8f   : > { %p2737_p9 = scmp.lt.s32.totalorder %s2735_s0, %s2728_s26 }
  0x90   : > { %p2731_p2 = pnand %p2729_p0, %p3450_p8 }
  0x91   : > { %p2738_p5 = por %p2737_p9, %p2736_p7 }
  0x92   : > { %p2732_p4 = pneg %p2731_p2 }
  0x94   : > { %p2739_p10 = pnand %p2738_p5, %p2732_p4 }
  0x96   : > { %2742 = shalt.err (!%p2739_p10)
}
  0x97   : > { %2441 = dma.hbm_to_vmem [thread:$0]  (!%p3434_p6), %s4161_s7, 16, %s555_s30, [#allocation18]  }
  0x98   : > { %s4162_s9 = sld [smem:[#allocation64_spill]] }
  0x9e   : > { %s2743_s25 = scalar_lea.hbm %s4162_s9, 16 }
  0x9f   : > { %p2744_p1 = scmp.ne.s32.totalorder %s4162_s9, %s2743_s25  ;;  %p2750_p12 = scmp.lt.u32.totalorder %s2743_s25, %s4162_s9 }
  0xa1   : > { %p2746_p3 = pnand %p2744_p1, %p3450_p8 }
  0xa3   : > { %p2747_p11 = pneg %p2746_p3 }
  0xa5   : > { %p2752_p13 = pnand %p2750_p12, %p2747_p11 }
  0xa7   : > { %2755 = shalt.err (!%p2752_p13)
}
  0xa8   : > { %s2756_s26 = scalar_lea.vmem %s579_s21, 16  ;;  %s2763_s30 = scalar_lea.vmem %s579_s21, 32 }
  0xa9   : > { %p2757_p0 = scmp.ne.s32.totalorder %s579_s21, %s2756_s26  ;;  %p2764_p7 = scmp.lt.s32.totalorder %s579_s21, %s579_s21 }
  0xaa   : > { %p2765_p9 = scmp.lt.s32.totalorder %s2763_s30, %s2756_s26 }
  0xab   : > { %p2759_p2 = pnand %p2757_p0, %p3450_p8 }
  0xac   : > { %p2766_p5 = por %p2765_p9, %p2764_p7 }
  0xad   : > { %p2760_p4 = pneg %p2759_p2 }
  0xaf   : > { %p2767_p10 = pnand %p2766_p5, %p2760_p4 }
  0xb1   : > { %2770 = shalt.err (!%p2767_p10)
}
  0xb2   : > { %2447 = dma.hbm_to_vmem [thread:$0]  (!%p3434_p6), %s4162_s9, 16, %s579_s21, [#allocation21]  }
  0xb3   : > { %s3270_s20 = smov [#allocation23]   ;;  %s3271_s23 = smov [#allocation26]  }
  0xb4   : > { %s600_s28 = sshll.u32 %s3270_s20, 4  ;;  %s624_s25 = sshll.u32 %s3271_s23, 4  ;;  %s601_s28 = int_to_ptr.vmem [resolvable:$true] %s600_s28  ;;  %s625_s25 = int_to_ptr.vmem [resolvable:$true] %s624_s25 }
  0xb5   : > { %s2771_s24 = scalar_lea.hbm %s4103_s11, 16 }
  0xb6   : > { %p2772_p1 = scmp.ne.s32.totalorder %s4103_s11, %s2771_s24  ;;  %p2778_p12 = scmp.lt.u32.totalorder %s2771_s24, %s4103_s11 }
  0xb8   : > { %p2774_p3 = pnand %p2772_p1, %p3450_p8 }
  0xba   : > { %p2775_p11 = pneg %p2774_p3 }
  0xbc   : > { %p2780_p13 = pnand %p2778_p12, %p2775_p11 }
  0xbe   : > { %2783 = shalt.err (!%p2780_p13)
}
  0xbf   : > { %s2784_s21 = scalar_lea.vmem %s601_s28, 16  ;;  %s2791_s19 = scalar_lea.vmem %s601_s28, 32 }
  0xc0   : > { %p2785_p0 = scmp.ne.s32.totalorder %s601_s28, %s2784_s21  ;;  %p2792_p7 = scmp.lt.s32.totalorder %s601_s28, %s601_s28 }
  0xc1   : > { %p2793_p9 = scmp.lt.s32.totalorder %s2791_s19, %s2784_s21 }
  0xc2   : > { %p2787_p2 = pnand %p2785_p0, %p3450_p8 }
  0xc3   : > { %p2794_p5 = por %p2793_p9, %p2792_p7 }
  0xc4   : > { %p2788_p4 = pneg %p2787_p2 }
  0xc6   : > { %p2795_p10 = pnand %p2794_p5, %p2788_p4 }
  0xc8   : > { %2798 = shalt.err (!%p2795_p10)
}
  0xc9   : > { %2453 = dma.hbm_to_vmem [thread:$0]  (!%p3434_p6), %s4103_s11, 16, %s601_s28, [#allocation24]  }
  0xca   : > { %s2799_s24 = scalar_lea.hbm %s4105_s13, 16 }
  0xcb   : > { %p2800_p1 = scmp.ne.s32.totalorder %s4105_s13, %s2799_s24  ;;  %p2806_p12 = scmp.lt.u32.totalorder %s2799_s24, %s4105_s13 }
  0xcd   : > { %p2802_p3 = pnand %p2800_p1, %p3450_p8 }
  0xcf   : > { %p2803_p11 = pneg %p2802_p3 }
  0xd1   : > { %p2808_p13 = pnand %p2806_p12, %p2803_p11 }
  0xd3   : > { %2811 = shalt.err (!%p2808_p13)
}
  0xd4   : > { %s2812_s21 = scalar_lea.vmem %s625_s25, 16  ;;  %s2819_s28 = scalar_lea.vmem %s625_s25, 32 }
  0xd5   : > { %p2813_p0 = scmp.ne.s32.totalorder %s625_s25, %s2812_s21  ;;  %p2820_p7 = scmp.lt.s32.totalorder %s625_s25, %s625_s25 }
  0xd6   : > { %p2821_p9 = scmp.lt.s32.totalorder %s2819_s28, %s2812_s21 }
  0xd7   : > { %p2815_p2 = pnand %p2813_p0, %p3450_p8 }
  0xd8   : > { %p2822_p5 = por %p2821_p9, %p2820_p7 }
  0xd9   : > { %p2816_p4 = pneg %p2815_p2 }
  0xdb   : > { %p2823_p10 = pnand %p2822_p5, %p2816_p4 }
  0xdd   : > { %2826 = shalt.err (!%p2823_p10)
}
  0xde   : > { %2459 = dma.hbm_to_vmem [thread:$0]  (!%p3434_p6), %s4105_s13, 16, %s625_s25, [#allocation27]  }
  0xdf   : > { %s3272_s23 = smov [#allocation29]   ;;  %s3273_s22 = smov [#allocation13]  }
  0xe0   : > { %s648_s18 = sshll.u32 %s3272_s23, 4  ;;  %s518_s24 = sshll.u32 %s3273_s22, 4  ;;  %s649_s18 = int_to_ptr.vmem [resolvable:$true] %s648_s18  ;;  %s519_s24 = int_to_ptr.vmem [resolvable:$true] %s518_s24 }
  0xe1   : > { %s2827_s30 = scalar_lea.hbm %s4107_s15, 16 }
  0xe2   : > { %p2828_p1 = scmp.ne.s32.totalorder %s4107_s15, %s2827_s30  ;;  %p2834_p12 = scmp.lt.u32.totalorder %s2827_s30, %s4107_s15 }
  0xe4   : > { %p2830_p3 = pnand %p2828_p1, %p3450_p8 }
  0xe6   : > { %p2831_p11 = pneg %p2830_p3 }
  0xe8   : > { %p2836_p13 = pnand %p2834_p12, %p2831_p11 }
  0xea   : > { %2839 = shalt.err (!%p2836_p13)
}
  0xeb   : > { %s2840_s25 = scalar_lea.vmem %s649_s18, 16  ;;  %s2847_s20 = scalar_lea.vmem %s649_s18, 32 }
  0xec   : > { %p2841_p0 = scmp.ne.s32.totalorder %s649_s18, %s2840_s25  ;;  %p2848_p7 = scmp.lt.s32.totalorder %s649_s18, %s649_s18 }
  0xed   : > { %p2849_p9 = scmp.lt.s32.totalorder %s2847_s20, %s2840_s25 }
  0xee   : > { %p2843_p2 = pnand %p2841_p0, %p3450_p8 }
  0xef   : > { %p2850_p5 = por %p2849_p9, %p2848_p7 }
  0xf0   : > { %p2844_p4 = pneg %p2843_p2 }
  0xf2   : > { %p2851_p10 = pnand %p2850_p5, %p2844_p4 }
  0xf4   : > { %2854 = shalt.err (!%p2851_p10)
}
  0xf5   : > { %2465 = dma.hbm_to_vmem [thread:$0]  (!%p3434_p6), %s4107_s15, 16, %s649_s18, [#allocation30]  }
  0xf6   : > { %s4163_s4 = sld [smem:[#allocation59_spill]] }
  0xfc   : > { %s2855_s30 = scalar_lea.hbm %s4163_s4, 256 }
  0xfd   : > { %p2856_p1 = scmp.ne.s32.totalorder %s4163_s4, %s2855_s30  ;;  %p2862_p12 = scmp.lt.u32.totalorder %s2855_s30, %s4163_s4 }
  0xff   : > { %p2858_p3 = pnand %p2856_p1, %p3450_p8 }
 0x101   : > { %p2859_p11 = pneg %p2858_p3 }
 0x103   : > { %p2864_p13 = pnand %p2862_p12, %p2859_p11 }
 0x105   : > { %2867 = shalt.err (!%p2864_p13)
}
 0x106   : > { %s2868_s25 = scalar_lea.vmem %s519_s24, 256  ;;  %p2876_p7 = scmp.lt.s32.totalorder %s519_s24, %s519_s24 }
 0x107   : > { %p2869_p0 = scmp.ne.s32.totalorder %s519_s24, %s2868_s25  ;;  %p2877_p9 = scmp.lt.s32.totalorder %s2868_s25, %s2868_s25 }
 0x109   : > { %p2871_p2 = pnand %p2869_p0, %p3450_p8  ;;  %p2878_p5 = por %p2877_p9, %p2876_p7 }
 0x10b   : > { %p2872_p4 = pneg %p2871_p2 }
 0x10d   : > { %p2879_p10 = pnand %p2878_p5, %p2872_p4 }
 0x10f   : > { %2882 = shalt.err (!%p2879_p10)
}
 0x110   : > { %s4164_s18 = smov 64   ;;  %s3274_s22 = smov [#allocation16]  }
 0x111   : > { %2432 = dma.hbm_to_vmem [thread:$0]  (!%p3434_p6), %s4163_s4, 256, %s519_s24, [#allocation12], %s4164_s18, %s4164_s18, %s3267_s27  }
 0x112   : > { %s543_s29 = sshll.u32 %s3274_s22, 4  ;;  %s3275_s26 = smov [#allocation19]   ;;  %s544_s29 = int_to_ptr.vmem [resolvable:$true] %s543_s29 }
 0x113   : > { %s564_s30 = sshll.u32 %s3275_s26, 4  ;;  %s4165_s6 = sld [smem:[#allocation61_spill]]  ;;  %s565_s30 = int_to_ptr.vmem [resolvable:$true] %s564_s30 }
 0x119   : > { %s2883_s28 = scalar_lea.hbm %s4165_s6, 16 }
 0x11a   : > { %p2884_p1 = scmp.ne.s32.totalorder %s4165_s6, %s2883_s28  ;;  %p2890_p12 = scmp.lt.u32.totalorder %s2883_s28, %s4165_s6 }
 0x11c   : > { %p2886_p3 = pnand %p2884_p1, %p3450_p8 }
 0x11e   : > { %p2887_p11 = pneg %p2886_p3 }
 0x120   : > { %p2892_p13 = pnand %p2890_p12, %p2887_p11 }
 0x122   : > { %2895 = shalt.err (!%p2892_p13)
}
 0x123   : > { %s2896_s24 = scalar_lea.vmem %s544_s29, 16  ;;  %s2903_s23 = scalar_lea.vmem %s544_s29, 32 }
 0x124   : > { %p2897_p0 = scmp.ne.s32.totalorder %s544_s29, %s2896_s24  ;;  %p2904_p7 = scmp.lt.s32.totalorder %s544_s29, %s544_s29 }
 0x125   : > { %p2905_p9 = scmp.lt.s32.totalorder %s2903_s23, %s2896_s24 }
 0x126   : > { %p2899_p2 = pnand %p2897_p0, %p3450_p8 }
 0x127   : > { %p2906_p5 = por %p2905_p9, %p2904_p7 }
 0x128   : > { %p2900_p4 = pneg %p2899_p2 }
 0x12a   : > { %p2907_p10 = pnand %p2906_p5, %p2900_p4 }
 0x12c   : > { %2910 = shalt.err (!%p2907_p10)
}
 0x12d   : > { %2438 = dma.hbm_to_vmem [thread:$0]  (!%p3434_p6), %s4165_s6, 16, %s544_s29, [#allocation15]  }
 0x12e   : > { %s4166_s8 = sld [smem:[#allocation63_spill]] }
 0x134   : > { %s2911_s21 = scalar_lea.hbm %s4166_s8, 256 }
 0x135   : > { %p2912_p1 = scmp.ne.s32.totalorder %s4166_s8, %s2911_s21  ;;  %p2918_p12 = scmp.lt.u32.totalorder %s2911_s21, %s4166_s8 }
 0x137   : > { %p2914_p3 = pnand %p2912_p1, %p3450_p8 }
 0x139   : > { %p2915_p11 = pneg %p2914_p3 }
 0x13b   : > { %p2920_p13 = pnand %p2918_p12, %p2915_p11 }
 0x13d   : > { %2923 = shalt.err (!%p2920_p13)
}
 0x13e   : > { %s2924_s24 = scalar_lea.vmem %s565_s30, 256  ;;  %p2932_p7 = scmp.lt.s32.totalorder %s565_s30, %s565_s30 }
 0x13f   : > { %p2925_p0 = scmp.ne.s32.totalorder %s565_s30, %s2924_s24  ;;  %p2933_p9 = scmp.lt.s32.totalorder %s2924_s24, %s2924_s24 }
 0x141   : > { %p2927_p2 = pnand %p2925_p0, %p3450_p8  ;;  %p2934_p5 = por %p2933_p9, %p2932_p7 }
 0x143   : > { %p2928_p4 = pneg %p2927_p2 }
 0x145   : > { %p2935_p10 = pnand %p2934_p5, %p2928_p4 }
 0x147   : > { %2938 = shalt.err (!%p2935_p10)
}
 0x148   : > { %2444 = dma.hbm_to_vmem [thread:$0]  (!%p3434_p6), %s4166_s8, 256, %s565_s30, [#allocation18], %s4164_s18, %s4164_s18, %s3267_s27  }
 0x149   : > { %s3276_s22 = smov [#allocation22]   ;;  %s3277_s3 = smov [#allocation25]  }
 0x14a   : > { %s589_s26 = sshll.u32 %s3276_s22, 4  ;;  %s610_s0 = sshll.u32 %s3277_s3, 4  ;;  %s590_s26 = int_to_ptr.vmem [resolvable:$true] %s589_s26  ;;  %s611_s0 = int_to_ptr.vmem [resolvable:$true] %s610_s0 }
 0x14b   : > { %s4167_s10 = sld [smem:[#allocation65_spill]] }
 0x151   : > { %s2939_s19 = scalar_lea.hbm %s4167_s10, 16 }
 0x152   : > { %p2940_p1 = scmp.ne.s32.totalorder %s4167_s10, %s2939_s19  ;;  %p2946_p12 = scmp.lt.u32.totalorder %s2939_s19, %s4167_s10 }
 0x154   : > { %p2942_p3 = pnand %p2940_p1, %p3450_p8 }
 0x156   : > { %p2943_p11 = pneg %p2942_p3 }
 0x158   : > { %p2948_p13 = pnand %p2946_p12, %p2943_p11 }
 0x15a   : > { %2951 = shalt.err (!%p2948_p13)
}
 0x15b   : > { %s2952_s30 = scalar_lea.vmem %s590_s26, 16  ;;  %s2959_s23 = scalar_lea.vmem %s590_s26, 32 }
 0x15c   : > { %p2953_p0 = scmp.ne.s32.totalorder %s590_s26, %s2952_s30  ;;  %p2960_p7 = scmp.lt.s32.totalorder %s590_s26, %s590_s26 }
 0x15d   : > { %p2961_p9 = scmp.lt.s32.totalorder %s2959_s23, %s2952_s30 }
 0x15e   : > { %p2955_p2 = pnand %p2953_p0, %p3450_p8 }
 0x15f   : > { %p2962_p5 = por %p2961_p9, %p2960_p7 }
 0x160   : > { %p2956_p4 = pneg %p2955_p2 }
 0x162   : > { %p2963_p10 = pnand %p2962_p5, %p2956_p4 }
 0x164   : > { %2966 = shalt.err (!%p2963_p10)
}
 0x165   : > { %2450 = dma.hbm_to_vmem [thread:$0]  (!%p3434_p6), %s4167_s10, 16, %s590_s26, [#allocation21]  }
 0x166   : > { %s2967_s19 = scalar_lea.hbm %s4104_s12, 256 }
 0x167   : > { %p2968_p1 = scmp.ne.s32.totalorder %s4104_s12, %s2967_s19  ;;  %p2974_p12 = scmp.lt.u32.totalorder %s2967_s19, %s4104_s12 }
 0x169   : > { %p2970_p3 = pnand %p2968_p1, %p3450_p8 }
 0x16b   : > { %p2971_p11 = pneg %p2970_p3 }
 0x16d   : > { %p2976_p13 = pnand %p2974_p12, %p2971_p11 }
 0x16f   : > { %2979 = shalt.err (!%p2976_p13)
}
 0x170   : > { %s2980_s30 = scalar_lea.vmem %s611_s0, 256  ;;  %p2988_p7 = scmp.lt.s32.totalorder %s611_s0, %s611_s0 }
 0x171   : > { %p2981_p0 = scmp.ne.s32.totalorder %s611_s0, %s2980_s30  ;;  %p2989_p9 = scmp.lt.s32.totalorder %s2980_s30, %s2980_s30 }
 0x173   : > { %p2983_p2 = pnand %p2981_p0, %p3450_p8  ;;  %p2990_p5 = por %p2989_p9, %p2988_p7 }
 0x175   : > { %p2984_p4 = pneg %p2983_p2 }
 0x177   : > { %p2991_p10 = pnand %p2990_p5, %p2984_p4 }
 0x179   : > { %2994 = shalt.err (!%p2991_p10)
}
 0x17a   : > { %2456 = dma.hbm_to_vmem [thread:$0]  (!%p3434_p6), %s4104_s12, 256, %s611_s0, [#allocation24], %s4164_s18, %s4164_s18, %s3267_s27  }
 0x17b   : > { %s3278_s22 = smov [#allocation28]   ;;  %s3279_s21 = smov [#allocation31]  }
 0x17c   : > { %s634_s3 = sshll.u32 %s3278_s22, 4  ;;  %s659_s28 = sshll.u32 %s3279_s21, 4  ;;  %s635_s3 = int_to_ptr.vmem [resolvable:$true] %s634_s3  ;;  %s660_s28 = int_to_ptr.vmem [resolvable:$true] %s659_s28 }
 0x17d   : > { %s2995_s20 = scalar_lea.hbm %s4106_s14, 1024 }
 0x17e   : > { %p2996_p1 = scmp.ne.s32.totalorder %s4106_s14, %s2995_s20  ;;  %p3002_p12 = scmp.lt.u32.totalorder %s2995_s20, %s4106_s14 }
 0x180   : > { %p2998_p3 = pnand %p2996_p1, %p3450_p8 }
 0x182   : > { %p2999_p11 = pneg %p2998_p3 }
 0x184   : > { %p3004_p13 = pnand %p3002_p12, %p2999_p11 }
 0x186   : > { %3007 = shalt.err (!%p3004_p13)
}
 0x187   : > { %s3008_s0 = scalar_lea.vmem %s635_s3, 1024  ;;  %p3016_p7 = scmp.lt.s32.totalorder %s635_s3, %s635_s3 }
 0x188   : > { %p3009_p0 = scmp.ne.s32.totalorder %s635_s3, %s3008_s0  ;;  %p3017_p9 = scmp.lt.s32.totalorder %s3008_s0, %s3008_s0 }
 0x18a   : > { %p3011_p2 = pnand %p3009_p0, %p3450_p8  ;;  %p3018_p5 = por %p3017_p9, %p3016_p7 }
 0x18c   : > { %p3012_p4 = pneg %p3011_p2 }
 0x18e   : > { %p3019_p10 = pnand %p3018_p5, %p3012_p4 }
 0x190   : > { %3022 = shalt.err (!%p3019_p10)
}
 0x191   : > { %2462 = dma.hbm_to_vmem [thread:$0]  (!%p3434_p6), %s4106_s14, 1024, %s635_s3, [#allocation27], %s4164_s18, %s4164_s18, %s3267_s27  }
 0x192   : > { %s3023_s25 = scalar_lea.hbm %s4108_s16, 16 }
 0x193   : > { %p3024_p1 = scmp.ne.s32.totalorder %s4108_s16, %s3023_s25  ;;  %p3030_p12 = scmp.lt.u32.totalorder %s3023_s25, %s4108_s16 }
 0x195   : > { %p3026_p3 = pnand %p3024_p1, %p3450_p8 }
 0x197   : > { %p3027_p11 = pneg %p3026_p3 }
 0x199   : > { %p3032_p13 = pnand %p3030_p12, %p3027_p11 }
 0x19b   : > { %3035 = shalt.err (!%p3032_p13)
}
 0x19c   : > { %s3036_s26 = scalar_lea.vmem %s660_s28, 16  ;;  %s3043_s27 = scalar_lea.vmem %s660_s28, 32 }
 0x19d   : > { %p3037_p0 = scmp.ne.s32.totalorder %s660_s28, %s3036_s26  ;;  %p3044_p7 = scmp.lt.s32.totalorder %s660_s28, %s660_s28 }
 0x19e   : > { %p3045_p9 = scmp.lt.s32.totalorder %s3043_s27, %s3036_s26 }
 0x19f   : > { %p3039_p2 = pnand %p3037_p0, %p3450_p8 }
 0x1a0   : > { %p3046_p5 = por %p3045_p9, %p3044_p7 }
 0x1a1   : > { %p3040_p4 = pneg %p3039_p2 }
 0x1a3   : > { %p3047_p10 = pnand %p3046_p5, %p3040_p4 }
 0x1a5   : > { %3050 = shalt.err (!%p3047_p10)
}
 0x1a6   : > { %2468 = dma.hbm_to_vmem [thread:$0]  (!%p3434_p6), %s4108_s16, 16, %s660_s28, [#allocation30]  }
 0x1a7   : > { %s3280_s0 = smov [#allocation32]   ;;  %s4168_s19 = sld [smem:[#allocation66_spill]] }
 0x1a8   : > { %s670_s23 = sshll.u32 %s3280_s0, 4  ;;  %s671_s23 = int_to_ptr.vmem [resolvable:$true] %s670_s23 }
 0x1ad   : > { %s4169_s25 = smov %s4168_s19  ;;  %s3051_s20 = scalar_lea.hbm %s4168_s19, 16 }
 0x1ae   : > { %p3052_p1 = scmp.ne.s32.totalorder %s4169_s25, %s3051_s20  ;;  %p3058_p12 = scmp.lt.u32.totalorder %s3051_s20, %s4169_s25 }
 0x1b0   : > { %p3054_p3 = pnand %p3052_p1, %p3450_p8 }
 0x1b2   : > { %p3055_p11 = pneg %p3054_p3 }
 0x1b4   : > { %p3060_p13 = pnand %p3058_p12, %p3055_p11 }
 0x1b6   : > { %3063 = shalt.err (!%p3060_p13)
}
 0x1b7   : > { %s3064_s28 = scalar_lea.vmem %s671_s23, 16  ;;  %s3071_s27 = scalar_lea.vmem %s671_s23, 32 }
 0x1b8   : > { %p3065_p0 = scmp.ne.s32.totalorder %s671_s23, %s3064_s28  ;;  %p3072_p7 = scmp.lt.s32.totalorder %s671_s23, %s671_s23 }
 0x1b9   : > { %p3073_p9 = scmp.lt.s32.totalorder %s3071_s27, %s3064_s28 }
 0x1ba   : > { %p3067_p2 = pnand %p3065_p0, %p3450_p8 }
 0x1bb   : > { %p3074_p5 = por %p3073_p9, %p3072_p7 }
 0x1bc   : > { %p3068_p4 = pneg %p3067_p2 }
 0x1be   : > { %p3075_p10 = pnand %p3074_p5, %p3068_p4 }
 0x1c0   : > { %3078 = shalt.err (!%p3075_p10)
}
 0x1c1   : > { %s4170_s0 = sld [smem:[#allocation52_spill]]  ;;  %s4171_s22 = sld [smem:[#allocation51_spill]] }
 0x1c2   : > { %s4172_s21 = sld [smem:[#allocation49_spill]]  ;;  %s4173_s19 = sld [smem:[#allocation48_spill]] }
 0x1c3   : > { %s4174_s1 = sld [smem:[#allocation47_spill]]  ;;  %s4175_s20 = sld [smem:[#allocation53_spill]] }
 0x1c4   : > { %2471 = dma.hbm_to_vmem [thread:$0]  (!%p3434_p6), %s4169_s25, 16, %s671_s23, [#allocation33]  }
 0x1c5   : > { %s4181_s4 = sld [smem:[#allocation55_spill]] }
 0x1c7   : > { %s2115_s24 = sadd.s32 4294967294, %s4170_s0   ;;  %s57_s29 = sadd.s32 1, %s4171_s22 }
 0x1c8   : > { %p59_p8 = scmp.ge.s32.totalorder %s57_s29, 2  ;;  %s66_s2 = sadd.s32 1, %s4172_s21 }
 0x1c9   : > { %p73_p1 = scmp.ne.s32.totalorder %s4172_s21, %s4173_s19  ;;  %p74_p3 = scmp.eq.s32.totalorder %s4170_s0, 0 }
 0x1ca   : > { %s4224_s29 = smov (%p59_p8, %s57_s29), 0  ;;  %p79_p12 = scmp.ne.s32.totalorder %s4173_s19, %s4174_s1 }
 0x1cb   : > { %p3773_p11 = por %p74_p3, %p73_p1  ;;  %s63_s23 = ssub.s32 %s4171_s22, %s4224_s29 }
 0x1cc   : > { %p467_p6 = scmp.eq.s32.totalorder %s4175_s20, 1  ;;  %p64_p13 = scmp.eq.s32.totalorder %s63_s23, 0 }
 0x1cd   : > { %p4177_p0 = scmp.eq.s32.totalorder %s4175_s20, 0  ;;  %p473_p7 = scmp.eq.s32.totalorder %s2115_s24, 1 }
 0x1ce   : > { %p3788_p4 = por %p467_p6, %p73_p1  ;;  %p2499_p5 = scmp.lt.s32.totalorder %s4170_s0, 2 }
 0x1cf   : > { %p3784_p2 = por %p4177_p0, %p79_p12  ;;  %p3795_p9 = por %p473_p7, %p79_p12 }
 0x1d0   : > { %s4179_s28 = scalar_select %p3788_p4, 1, 0 }
 0x1d1   : > { %s4178_s26 = scalar_select %p3784_p2, 1, 0 }
 0x1d2   : > { %s3793_s27 = scalar_select %p64_p13, %s4172_s21, %s66_s2  }
 0x1d3   : > { %s4180_s18 = scalar_select %p3795_p9, 1, 0 }
 0x1d4   : > { %s3801_s3 = sand.u32 1, %s4172_s21   ;;  %s2135_s19 = sshll.u32 %s4171_s22, 7 }
 0x1d5   : > { %s2134_s1 = sshll.u32 %s3801_s3, 3  ;;  %s3808_s5 = scalar_lea.hbm %s4181_s4, %s2135_s19 }
 0x1d6   : > { %s685_s24 = scalar_lea.vmem [#allocation5], %s2134_s1  ;;  %p3812_p10 = pnand %p2499_p5, %p3773_p11 }
 0x1d7   : > { %s693_s2 = sshll.u32 %s685_s24, 4  ;;  %s682_s7 = scalar_lea.sflag [#allocation6], %s3801_s3  ;;  %s3816_s2 = int_to_ptr.vmem [resolvable:$true] %s693_s2 }
 0x1d8   : > { %s3079_s20 = scalar_lea.hbm %s3808_s5, 128  ;;  %p3081_p1 = pneg %p3812_p10 }
 0x1d9   : > { %p3080_p8 = scmp.ne.s32.totalorder %s3808_s5, %s3079_s20  ;;  %s3084_s1 = scalar_lea.hbm %s4181_s4, 256 }
 0x1da   : > { %p3085_p11 = scmp.lt.u32.totalorder %s3808_s5, %s4181_s4  ;;  %p3086_p6 = scmp.lt.u32.totalorder %s3084_s1, %s3079_s20 }
 0x1db   : > { %p3082_p3 = pnand %p3081_p1, %p3080_p8  ;;  %p3088_p0 = scmp.lt.u32.totalorder %s3079_s20, %s3808_s5 }
 0x1dc   : > { %p3087_p13 = por %p3086_p6, %p3085_p11 }
 0x1dd   : > { %p3083_p12 = pneg %p3082_p3 }
 0x1de   : > { %p3089_p7 = por %p3088_p0, %p3087_p13 }
 0x1e0   : > { %p3090_p5 = pnand %p3089_p7, %p3083_p12 }
 0x1e2   : > { %3093 = shalt.err (!%p3090_p5)
}
 0x1e3   : > { %s3094_s21 = scalar_lea.vmem %s3816_s2, 128  ;;  %s3281_s19 = smov [#allocation5]  }
 0x1e4   : > { %p3095_p8 = scmp.ne.s32.totalorder %s3816_s2, %s3094_s21  ;;  %s3099_s30 = sshll.u32 %s3281_s19, 4  ;;  %s3100_s30 = int_to_ptr.vmem [resolvable:$false] %s3099_s30 }
 0x1e5   : > { %s3101_s23 = scalar_lea.vmem %s3100_s30, 256  ;;  %p3102_p4 = scmp.lt.s32.totalorder %s3816_s2, %s3100_s30 }
 0x1e6   : > { %p3097_p3 = pnand %p3095_p8, %p3081_p1  ;;  %p3103_p11 = scmp.lt.s32.totalorder %s3101_s23, %s3094_s21 }
 0x1e8   : > { %p3098_p9 = pneg %p3097_p3  ;;  %p3104_p6 = por %p3103_p11, %p3102_p4 }
 0x1ea   : > { %p3105_p13 = pnand %p3104_p6, %p3098_p9 }
 0x1ec   : > { %3108 = shalt.err (!%p3105_p13)
}
 0x1ed   : > { %2475 = dma.hbm_to_vmem [thread:$0]  (!%p3812_p10), %s3808_s5, 128, %s3816_s2, %s682_s7  }
 0x1ee   : > { %s2136_s20 = sshll.u32 %s3801_s3, 2  ;;  %s2137_s1 = sshll.u32 %s4171_s22, 6 }
 0x1ef   : > { %s4183_s4 = sld [smem:[#allocation56_spill]]  ;;  %s704_s21 = scalar_lea.vmem [#allocation8], %s2136_s20 }
 0x1f0   : > { %s711_s30 = sshll.u32 %s704_s21, 4  ;;  %s4184_s23 = sand.u32 1, %s4170_s0   ;;  %s712_s30 = int_to_ptr.vmem [resolvable:$true] %s711_s30 }
 0x1f1   : > { %s701_s9 = scalar_lea.sflag [#allocation9], %s4184_s23 }
 0x1f5   : > { %s3850_s8 = scalar_lea.hbm %s4183_s4, %s2137_s1  ;;  %s3114_s22 = scalar_lea.hbm %s4183_s4, 128 }
 0x1f6   : > { %s3109_s10 = scalar_lea.hbm %s3850_s8, 64  ;;  %p3115_p0 = scmp.lt.u32.totalorder %s3850_s8, %s4183_s4 }
 0x1f7   : > { %p3110_p4 = scmp.ne.s32.totalorder %s3850_s8, %s3109_s10  ;;  %p3116_p7 = scmp.lt.u32.totalorder %s3114_s22, %s3109_s10 }
 0x1f8   : > { %p3118_p8 = scmp.lt.u32.totalorder %s3109_s10, %s3850_s8 }
 0x1f9   : > { %p3112_p9 = pnand %p3110_p4, %p3081_p1  ;;  %p3117_p5 = por %p3116_p7, %p3115_p0 }
 0x1fb   : > { %p3113_p12 = pneg %p3112_p9  ;;  %p3119_p3 = por %p3118_p8, %p3117_p5 }
 0x1fd   : > { %p3120_p11 = pnand %p3119_p3, %p3113_p12 }
 0x1ff   : > { %3123 = shalt.err (!%p3120_p11)
}
 0x200   : > { %s3124_s0 = scalar_lea.vmem %s712_s30, 64  ;;  %s3282_s20 = smov [#allocation8]  }
 0x201   : > { %p3125_p6 = scmp.ne.s32.totalorder %s712_s30, %s3124_s0  ;;  %s3129_s1 = sshll.u32 %s3282_s20, 4  ;;  %s3130_s1 = int_to_ptr.vmem [resolvable:$false] %s3129_s1 }
 0x202   : > { %s3131_s24 = scalar_lea.vmem %s3130_s1, 128  ;;  %p3132_p9 = scmp.lt.s32.totalorder %s712_s30, %s3130_s1 }
 0x203   : > { %p3127_p13 = pnand %p3125_p6, %p3081_p1  ;;  %p3133_p2 = scmp.lt.s32.totalorder %s3131_s24, %s3124_s0 }
 0x205   : > { %p3128_p4 = pneg %p3127_p13  ;;  %p3134_p0 = por %p3133_p2, %p3132_p9 }
 0x207   : > { %p3135_p7 = pnand %p3134_p0, %p3128_p4 }
 0x209   : > { %3138 = shalt.err (!%p3135_p7)
}
 0x20a   : > { %2478 = dma.hbm_to_vmem [thread:$0]  (!%p3812_p10), %s3850_s8, 64, %s712_s30, %s701_s9  }
 0x20b   : > { %s4185_s10 = sld [smem:[#allocation54_spill]] }
 0x211   : > { %p4186_p12 = scmp.ne.s32.totalorder %s4185_s10, 0 }
 0x212   : > { %s4187_s19 = sld [smem:[#allocation48_spill]] (!%p4186_p12)  ;;  %p4188_p2 = scmp.ne.s32.totalorder (!%p4186_p12), %s4178_s26, 0 }
 0x213   : > { %720 = sbr.rel (%p4186_p12) target bundleno = 3110 (0xc26), region = 92 }
 0x218   : > { %s3876_s21 = sand.u32 (!%p4186_p12), 1, %s4187_s19  }
 0x219   : > { %s2139_s23 = sshll.u32 (!%p4186_p12), %s3876_s21, 3  ;;  %s723_s5 = scalar_lea.sflag (!%p4186_p12), [#allocation6], %s3876_s21 }
 0x21a   : > { %s3882_s7 = scalar_lea.vmem [#allocation5], %s2139_s23 }
 0x21b   : > { %3192 = dma.done.wait (%p4188_p2), %s723_s5, 128  }
 0x21c   : > { %3194 = vsyncadd (%p4188_p2), %s723_s5, 4294967168  ;;  %s4189_s6 = sld [smem:[#allocation53_spill]]  ;;  %s2140_s9 = sshll.u32 %s3876_s21, 2 }
 0x21d   : > { %s3890_s22 = scalar_lea.vmem [#allocation8], %s2140_s9 }
 0x222   : > { %s731_s8 = sand.u32 1, %s4189_s6  }
 0x223   : > { %s732_s30 = scalar_lea.sflag [#allocation9], %s731_s8 }
 0x224   : > { %3196 = dma.done.wait (%p4188_p2), %s732_s30, 64  }
 0x225   : > { %3198 = vsyncadd (%p4188_p2), %s732_s30, 4294967232  ;;  %p4190_p10 = scmp.eq.s32.totalorder %s4189_s6, 0 }
 0x227   : > { %3200 = dma.done.wait (%p4190_p10), [#allocation9], 256   ;;  %p4191_p1 = pmov %p4190_p10 }
 0x229   : > { %3202 = vsyncadd (%p4191_p1), [#allocation9], 4294967040  ;;  %p4192_p5 = pmov %p4191_p1 }
 0x22a   : > { %p4193_p8 = pmov %p4191_p1 }
 0x22b   : > { %3204 = dma.done.wait (%p4192_p5), [#allocation12], 512  }
 0x22c   : > { %3206 = vsyncadd (%p4193_p8), [#allocation12], 4294966784  ;;  %p4194_p3 = pmov %p4191_p1 }
 0x22d   : > { %p4195_p11 = pmov %p4191_p1 }
 0x22e   : > { %3208 = dma.done.wait (%p4194_p3), [#allocation15], 32  }
 0x22f   : > { %3210 = vsyncadd (%p4195_p11), [#allocation15], 4294967264  ;;  %p4196_p6 = pmov %p4191_p1 }
 0x230   : > { %p4197_p13 = pmov %p4191_p1 }
 0x231   : > { %3212 = dma.done.wait (%p4196_p6), [#allocation18], 272  }
 0x232   : > { %3214 = vsyncadd (%p4197_p13), [#allocation18], 4294967024  ;;  %p4198_p4 = pmov %p4191_p1 }
 0x233   : > { %p4199_p9 = pmov %p4191_p1 }
 0x234   : > { %3216 = dma.done.wait (%p4198_p4), [#allocation21], 32  }
 0x235   : > { %3218 = vsyncadd (%p4199_p9), [#allocation21], 4294967264  ;;  %p4200_p0 = pmov %p4191_p1 }
 0x237   : > { %3220 = dma.done.wait (%p4200_p0), [#allocation24], 272   ;;  %p4201_p7 = pmov %p4200_p0 }
 0x238   : > { %p4202_p12 = pmov %p4200_p0 }
 0x239   : > { %3222 = vsyncadd (%p4201_p7), [#allocation24], 4294967024 }
 0x23a   : > { %3224 = dma.done.wait (%p4202_p12), [#allocation27], 1040   ;;  %p4203_p2 = pmov %p4200_p0 }
 0x23b   : > { %p4204_p10 = pmov %p4200_p0 }
 0x23c   : > { %3226 = vsyncadd (%p4203_p2), [#allocation27], 4294966256 }
 0x23d   : > { %3228 = dma.done.wait (%p4204_p10), [#allocation30], 32   ;;  %p4205_p1 = pmov %p4200_p0 }
 0x23e   : > { %p4206_p5 = pmov %p4200_p0 }
 0x23f   : > { %3230 = vsyncadd (%p4205_p1), [#allocation30], 4294967264 }
 0x240   : > { %3232 = dma.done.wait (%p4206_p5), [#allocation33], 16   ;;  %p4207_p8 = pmov %p4200_p0 }
 0x241   : > { %v3283_v0 = vmov 0.0   ;;  %vm3284_vm0 = vmmov 0   ;;  %v2591_v1 = vld [vmem:[#allocation11] sm:$0xff]   ;;  %v2592_v2 = vld [vmem:[#allocation11 + $0x8] sm:$0xff]   ;;  %vm889_vm1 = vcmask 261120   ;;  %v2593_v4 = vld [vmem:[#allocation13] sm:$0xff]  }
 0x242   : > { %3234 = vsyncadd (%p4207_p8), [#allocation33], 4294967280  ;;  %2245 = vmatprep.subr.bf16.mxu0 %v3283_v0  ;;  %2249 = vmatprep.mubr.msk.bf16.mxu0 %vm3284_vm0, %v3283_v0  ;;  %v865_v3 = vld [vmem:[%s3890_s22] sm:$0xf]  ;;  %v2594_v5 = vld [vmem:[#allocation13 + $0x8] sm:$0xff]   ;;  %vm934_vm2 = vcmask 257024  }
 0x243   : > { %2269 = vmatprep.subr.bf16.mxu1 %v3283_v0  ;;  %2271 = vmatprep.mubr.msk.bf16.mxu1 %vm3284_vm0, %v3283_v0  ;;  %v2595_v6 = vld [vmem:[#allocation10] sm:$0xff]   ;;  %v2596_v7 = vld [vmem:[#allocation10 + $0x8] sm:$0xff]   ;;  %v2158_v10 = vld [vmem:[#allocation16] ss:$0 sm:$0xff]  ;;  %vm1072_vm3 = vcmask 64512   ;;  %s3285_s26 = smov 112  }
 0x244   : > { %2246 = vmatpush3.bf16.msra.mxu0 %v2591_v1  ;;  %v3950_v8 = vld [vmem:[%s3882_s7] sm:$0xff]  ;;  %s3286_s3 = smov 120   ;;  %vm1134_vm4 = vcmask 1043456   ;;  %s3287_s2 = smov 104   ;;  %vm1300_vm5 = vcmask 130112   ;;  %vm1416_vm6 = vcmask 195712  }
 0x245   : > { %2247 = vmatprep.subr.bf16.mxu0 %v3283_v0  ;;  %v1001_v9 = vpack.c.bf16 %v3950_v8, %v3950_v8  ;;  %v2162_v17 = vld [vmem:[#allocation17] ss:$0 sm:$0xff]  ;;  %v2166_v27 = vld [vmem:[#allocation14] ss:$0 sm:$0xff]  ;;  %s3288_s0 = smov 8   ;;  %s3289_s20 = smov 16  }
 0x246   : > { %s3290_s1 = smov 24   ;;  %vm1532_vm7 = vcmask 261312   ;;  %s4208_s24 = sld [smem:[#allocation50_spill]] }
 0x247   : > { %s856_s19 = scalar_lea.vmem [#allocation34], %s2139_s23  ;;  %s4209_s8 = sld [smem:[#allocation67_spill]] }
 0x248   : > { %2248 = vmatpush3.bf16.msra.mxu0 %v2592_v2  ;;  %s1859_s5 = sshll.u32 %s856_s19, 4  ;;  %s1845_s30 = scalar_lea.sflag [#allocation7], %s3876_s21  ;;  %s4044_s5 = int_to_ptr.vmem [resolvable:$true] %s1859_s5 }
 0x249   : > { %2253 = vmatprep.subr.bf16.mxu0 %v3283_v0  ;;  %s3139_s22 = scalar_lea.vmem %s4044_s5, 128  ;;  %p4210_p11 = scmp.ne.s32.totalorder %s4179_s28, 0 }
 0x24a   : > { %p3140_p3 = scmp.ne.s32.totalorder %s4044_s5, %s3139_s22  ;;  %s3291_s23 = smov [#allocation34]  }
 0x24b   : > { %2250 = vmatmul.mubr.msk.bf16.vlgmr.msra.gmra.mrb[0].mxu0 %vm889_vm1, %v865_v3 }
 0x24c   : > { %2254 = vmatpush3.bf16.msra.mxu0 %v2593_v4  ;;  %2257 = vmatprep.mubr.msk.bf16.mxu0 %vm3284_vm0, %v3283_v0  ;;  %s2202_s10 = sshll.u32 %s4208_s24, 7  ;;  %p3141_p6 = pnand %p3140_p3, %p4210_p11 }
 0x24d   : > { %2255 = vmatprep.subr.bf16.mxu0 %v3283_v0  ;;  %s4042_s9 = scalar_lea.hbm %s4209_s8, %s2202_s10 }
 0x24e   : > { %p3142_p13 = pneg %p3141_p6 }
 0x250   : > { %2256 = vmatpush3.bf16.msra.mxu0 %v2594_v5 }
 0x251   : > { %2261 = vmatprep.subr.bf16.mxu0 %v3283_v0 }
 0x253   : > { %2258 = vmatmul.mubr.msk.bf16.vlgmr.msra.gmra.mrb[4].mxu0 %vm889_vm1, %v865_v3 }
 0x254   : > { %2262 = vmatpush3.bf16.msra.mxu0 %v2595_v6  ;;  %2265 = vmatprep.mubr.msk.bf16.mxu0 %vm3284_vm0, %v3283_v0 }
 0x255   : > { %2263 = vmatprep.subr.bf16.mxu0 %v3283_v0 }
 0x258   : > { %2264 = vmatpush3.bf16.msra.mxu0 %v2596_v7 }
 0x259   : > { %2275 = vmatprep.subr.bf16.mxu0 %v3283_v0 }
 0x25b   : > { %2266 = vmatmul.mubr.msk.bf16.vlgmr.msra.gmra.mrb[8].mxu0 %vm889_vm1, %v1001_v9 }
 0x25c   : > { %2277 = vmatprep.mubr.msk.bf16.mxu0 %vm3284_vm0, %v3283_v0 }
 0x31e   : > { %v927_v11 = vpop.f32.mrb[0].mxu0 }
 0x31f   : > { %v928_v12 = vadd.f32 %v2158_v10, %v927_v11  ;;  %v2251_v13 = vpop.f32.mrb[1].mxu0 }
 0x320   : > { %v930_v14 = vpop.f32.mrb[2].mxu0 }
 0x321   : > { %v933_v15 = vpack.c.bf16 %v928_v12, %v928_v12  ;;  %v2252_v16 = vpop.f32.mrb[3].mxu0 }
 0x323   : > { %935 = vst.msk [vmem:[#allocation2] sm:$0xf] %vm934_vm2, %v933_v15 }
 0x326   : > { %v993_v18 = vpop.f32.mrb[4].mxu0 }
 0x327   : > { %v994_v19 = vadd.f32 %v2162_v17, %v993_v18  ;;  %v2259_v20 = vpop.f32.mrb[5].mxu0 }
 0x328   : > { %v996_v21 = vpop.f32.mrb[6].mxu0 }
 0x329   : > { %v999_v22 = vpack.c.bf16 %v994_v19, %v994_v19  ;;  %v2260_v23 = vpop.f32.mrb[7].mxu0 }
 0x32a   : > { %v1070_v24 = vld [vmem:[#allocation2] sm:$0xf] }
 0x32b   : > { %1000 = vst.msk [vmem:[#allocation3] sm:$0xf] %vm934_vm2, %v999_v22  ;;  %v1077_v25 = vsel %vm1072_vm3, %v1070_v24, 0  ;;  %v2172_v26 = vcombine.low %v1070_v24, %v1070_v24 }
 0x32c   : > { %2270 = vmatpush3.bf16.xpose.msra.mxu1 %v1077_v25 }
 0x32d   : > { %1304 = vrot.lane.b32.xlu1 %v2172_v26, %s3285_s26  ;;  %1185 = vrot.lane.b32.xlu0 %v2172_v26, %s3286_s3 }
 0x32e   : > { %v1063_v28 = vpop.f32.mrb[8].mxu0  ;;  %2281 = vmatprep.subr.bf16.mxu1 %v3283_v0 }
 0x32f   : > { %v1064_v29 = vadd.f32 %v2166_v27, %v1063_v28  ;;  %v2267_v30 = vpop.f32.mrb[9].mxu0 }
 0x330   : > { %v1066_v31 = vpop.f32.mrb[10].mxu0 }
 0x331   : > { %v1069_v32 = vpack.c.bf16 %v1064_v29, %v1064_v29  ;;  %v2268_v33 = vpop.f32.mrb[11].mxu0 }
 0x332   : > { %v1071_v34 = vld [vmem:[#allocation3] sm:$0xf] }
 0x333   : > { %1302 = vrot.lane.b32.xlu1 %v1069_v32, %s3285_s26  ;;  %1180 = vrot.lane.b32.xlu0 %v1069_v32, %s3286_s3  ;;  %v1136_v35 = vsel %vm1134_vm4, %v1071_v34, 0  ;;  %v2174_v7 = vcombine.low %v1071_v34, %v1071_v34 }
 0x334   : > { %2272 = vmatmul.mubr.msk.bf16.vlgmr.msra.gmra.mrb[0].mxu1 %vm1072_vm3, %v1069_v32  ;;  %2276 = vmatpush3.bf16.msra.mxu0 %v1136_v35 }
 0x335   : > { %2283 = vmatprep.mubr.msk.bf16.mxu1 %vm3284_vm0, %v3283_v0  ;;  %2287 = vmatprep.subr.bf16.mxu0 %v3283_v0 }
 0x337   : > { %1418 = vrot.lane.b32.xlu1 %v1069_v32, %s3287_s2  ;;  %1420 = vrot.lane.b32.xlu0 %v2172_v26, %s3287_s2 }
 0x39f   : > { %v1186_v36 = vpop.permute.xlu0 %1185  ;;  %v1305_v38 = vpop.permute.xlu1 %1304 }
 0x3a0   : > { %v1191_v37 = vsel %vm1072_vm3, %v1186_v36, 0  ;;  %v1310_v40 = vsel %vm1072_vm3, %v1305_v38, 0 }
 0x3a1   : > { %2282 = vmatpush3.bf16.xpose.msra.mxu1 %v1191_v37 }
 0x3a2   : > { %2293 = vmatprep.subr.bf16.mxu1 %v3283_v0 }
 0x3a5   : > { %v1181_v39 = vpop.permute.xlu0 %1180  ;;  %v1303_v42 = vpop.permute.xlu1 %1302 }
 0x3a8   : > { %2284 = vmatmul.mubr.msk.bf16.vlgmr.msra.gmra.mrb[4].mxu1 %vm1072_vm3, %v1181_v39 }
 0x3a9   : > { %2294 = vmatpush3.bf16.xpose.msra.mxu1 %v1310_v40  ;;  %2295 = vmatprep.mubr.msk.bf16.mxu1 %vm3284_vm0, %v3283_v0  ;;  %v1421_v41 = vpop.permute.xlu0 %1420  ;;  %v1419_v44 = vpop.permute.xlu1 %1418 }
 0x3aa   : > { %2305 = vmatprep.subr.bf16.mxu1 %v3283_v0  ;;  %v1426_v43 = vsel %vm1072_vm3, %v1421_v41, 0 }
 0x3b0   : > { %2296 = vmatmul.mubr.msk.bf16.vlgmr.msra.gmra.mrb[8].mxu1 %vm1072_vm3, %v1303_v42 }
 0x3b1   : > { %2306 = vmatpush3.bf16.xpose.msra.mxu1 %v1426_v43  ;;  %2307 = vmatprep.mubr.msk.bf16.mxu1 %vm3284_vm0, %v3283_v0 }
 0x3b2   : > { %2317 = vmatprep.subr.bf16.mxu1 %v3283_v0 }
 0x3b8   : > { %2308 = vmatmul.mubr.msk.bf16.vlgmr.msra.gmra.mrb[12].mxu1 %vm1072_vm3, %v1419_v44 }
 0x3b9   : > { %2321 = vmatprep.mubr.msk.bf16.mxu1 %vm3284_vm0, %v3283_v0 }
 0x407   : > { %v1113_v45 = vpop.f32.mrb[0].mxu1 }
 0x408   : > { %v2273_v46 = vpop.f32.mrb[1].mxu1  ;;  %v1119_v47 = vsel %vm1072_vm3, %v1113_v45, -inf }
 0x409   : > { %1120 = vmax.xlane.f32.xlu0 %v1119_v47  ;;  %v1116_v48 = vpop.f32.mrb[2].mxu1 }
 0x40a   : > { %v2274_v49 = vpop.f32.mrb[3].mxu1 }
 0x47b   : > { %v1227_v50 = vpop.f32.mrb[4].mxu1 }
 0x47c   : > { %v2285_v51 = vpop.f32.mrb[5].mxu1  ;;  %v1233_v52 = vsel %vm1072_vm3, %v1227_v50, -inf }
 0x47d   : > { %1234 = vmax.xlane.f32.xlu1 %v1233_v52  ;;  %v1230_v53 = vpop.f32.mrb[6].mxu1 }
 0x47e   : > { %v2286_v54 = vpop.f32.mrb[7].mxu1 }
 0x47f   : > { %v2599_v54 = vld [vmem:[#allocation19] sm:$0xff]  }
 0x480   : > { %2318 = vmatpush3.bf16.msra.mxu1 %v2599_v54 }
 0x481   : > { %2319 = vmatprep.subr.bf16.mxu1 %v3283_v0 }
 0x483   : > { %v1346_v55 = vpop.f32.mrb[8].mxu1 }
 0x484   : > { %v2297_v56 = vpop.f32.mrb[9].mxu1  ;;  %v1352_v57 = vsel %vm1072_vm3, %v1346_v55, -inf }
 0x485   : > { %1353 = vmax.xlane.f32.xlu0 %v1352_v57  ;;  %v1349_v58 = vpop.f32.mrb[10].mxu1 }
 0x486   : > { %v2298_v59 = vpop.f32.mrb[11].mxu1 }
 0x48b   : > { %v1462_v60 = vpop.f32.mrb[12].mxu1 }
 0x48c   : > { %v2309_v61 = vpop.f32.mrb[13].mxu1  ;;  %v1468_v62 = vsel %vm1072_vm3, %v1462_v60, -inf }
 0x48d   : > { %1469 = vmax.xlane.f32.xlu0 %v1468_v62  ;;  %v1465_v63 = vpop.f32.mrb[14].mxu1 }
 0x48e   : > { %v2310_v1 = vpop.f32.mrb[15].mxu1 }
 0x496   : > { %v1121_v2 = vpop.xlane.xlu0 %1120 }
 0x497   : > { %v1122_v3 = vsub.f32 %v1113_v45, %v1121_v2 }
 0x499   : > { %v1123_v4 = vmul.f32 1.442695, %v1122_v3 }
 0x49b   : > { %2611 = vpow2.f32 %v1123_v4 }
 0x4a5   : > { %v2612_v5 = vpop.eup %2611 }
 0x4a6   : > { %v1125_v6 = vsel %vm1072_vm3, %v2612_v5, 0.0 }
 0x4a7   : > { %1126 = vadd.xlane.f32.xlu1 %v1125_v6  ;;  %v2180_v6 = vld [vmem:[#allocation20] ss:$0 sm:$0xff] }
 0x4b8   : > { %1248 = vrot.lane.b32.xlu1 %v2174_v7, %s3286_s3 }
 0x50a   : > { %v1235_v9 = vpop.xlane.xlu1 %1234 }
 0x50b   : > { %v1236_v10 = vsub.f32 %v1227_v50, %v1235_v9 }
 0x50d   : > { %v1237_v11 = vmul.f32 1.442695, %v1236_v10 }
 0x50f   : > { %2613 = vpow2.f32 %v1237_v11 }
 0x512   : > { %v1354_v12 = vpop.xlane.xlu0 %1353 }
 0x513   : > { %v1355_v13 = vsub.f32 %v1346_v55, %v1354_v12  ;;  %v2600_v55 = vld [vmem:[#allocation19 + $0x8] sm:$0xff]  }
 0x514   : > { %2320 = vmatpush3.bf16.msra.mxu1 %v2600_v55 }
 0x515   : > { %v1356_v14 = vmul.f32 1.442695, %v1355_v13  ;;  %2333 = vmatprep.subr.bf16.mxu1 %v3283_v0 }
 0x517   : > { %2615 = vpow2.f32 %v1356_v14 }
 0x519   : > { %v2614_v15 = vpop.eup %2613 }
 0x51a   : > { %v1470_v16 = vpop.xlane.xlu0 %1469  ;;  %v1239_v17 = vsel %vm1072_vm3, %v2614_v15, 0.0 }
 0x51b   : > { %v1471_v18 = vsub.f32 %v1462_v60, %v1470_v16  ;;  %1240 = vadd.xlane.f32.xlu0 %v1239_v17 }
 0x51d   : > { %v1472_v19 = vmul.f32 1.442695, %v1471_v18 }
 0x51f   : > { %2617 = vpow2.f32 %v1472_v19 }
 0x521   : > { %v2616_v20 = vpop.eup %2615 }
 0x522   : > { %v1358_v21 = vsel %vm1072_vm3, %v2616_v20, 0.0 }
 0x523   : > { %1359 = vadd.xlane.f32.xlu1 %v1358_v21  ;;  %v2602_v21 = vld [vmem:[#allocation25 + $0x8] sm:$0xff]  }
 0x529   : > { %v2618_v22 = vpop.eup %2617 }
 0x52a   : > { %v1474_v23 = vsel %vm1072_vm3, %v2618_v22, 0.0 }
 0x52b   : > { %1475 = vadd.xlane.f32.xlu0 %v1474_v23  ;;  %v2604_v23 = vld [vmem:[#allocation28 + $0x8] sm:$0xff]  }
 0x534   : > { %v1127_v24 = vpop.xlane.xlu1 %1126  ;;  %1480 = vrot.lane.b32.xlu1 %v2174_v7, %s3287_s2 }
 0x535   : > { %2619 = vrcp.f32 %v1127_v24  ;;  %v2606_v24 = vld [vmem:[#allocation28 + $0x18] sm:$0xff]  }
 0x538   : > { %v1249_v27 = vpop.permute.xlu1 %1248 }
 0x539   : > { %v1254_v29 = vsel %vm1134_vm4, %v1249_v27, 0 }
 0x53f   : > { %v2620_v25 = vpop.eup %2619 }
 0x540   : > { %v1129_v26 = vmul.f32 %v2620_v25, %v2612_v5  ;;  %v2607_v25 = vld [vmem:[#allocation28 + $0x20] sm:$0xff]  }
 0x541   : > { %1364 = vrot.lane.b32.xlu0 %v2174_v7, %s3285_s26  ;;  %s3143_s26 = sshll.u32 %s3291_s23, 4  ;;  %s3144_s26 = int_to_ptr.vmem [resolvable:$false] %s3143_s26 }
 0x542   : > { %v1130_v28 = vpack.c.bf16 %v1129_v26, %v1129_v26  ;;  %v2608_v26 = vld [vmem:[#allocation28 + $0x28] sm:$0xff]   ;;  %s3145_s3 = scalar_lea.vmem %s3144_s26, 256  ;;  %p3146_p4 = scmp.lt.s32.totalorder %s4044_s5, %s3144_s26 }
 0x543   : > { %p3147_p9 = scmp.lt.s32.totalorder %s3145_s3, %s3139_s22 }
 0x544   : > { %2278 = vmatmul.mubr.msk.bf16.vlgmr.msra.gmra.mrb[12].mxu0 %vm1072_vm3, %v1130_v28 }
 0x545   : > { %2288 = vmatpush3.bf16.msra.mxu0 %v1254_v29  ;;  %2289 = vmatprep.mubr.msk.bf16.mxu0 %vm3284_vm0, %v3283_v0  ;;  %p3148_p0 = por %p3147_p9, %p3146_p4 }
 0x546   : > { %2299 = vmatprep.subr.bf16.mxu0 %v3283_v0 }
 0x547   : > { %p3149_p7 = pnand %p3148_p0, %p3142_p13 }
 0x5a8   : > { %v1241_v30 = vpop.xlane.xlu0 %1240 }
 0x5a9   : > { %2621 = vrcp.f32 %v1241_v30 }
 0x5b0   : > { %v1360_v31 = vpop.xlane.xlu1 %1359 }
 0x5b1   : > { %2623 = vrcp.f32 %v1360_v31  ;;  %v2184_v31 = vld [vmem:[#allocation22] ss:$0 sm:$0xff] }
 0x5b3   : > { %v2622_v32 = vpop.eup %2621 }
 0x5b4   : > { %v1243_v33 = vmul.f32 %v2622_v32, %v2614_v15  ;;  %v1481_v40 = vpop.permute.xlu1 %1480 }
 0x5b5   : > { %v1486_v42 = vsel %vm1134_vm4, %v1481_v40, 0 }
 0x5b6   : > { %v1244_v34 = vpack.c.bf16 %v1243_v33, %v1243_v33  ;;  %v2185_v33 = vld [vmem:[#allocation23] ss:$0 sm:$0xff] }
 0x5b8   : > { %2290 = vmatmul.mubr.msk.bf16.vlgmr.msra.gmra.mrb[16].mxu0 %vm1072_vm3, %v1244_v34  ;;  %v1476_v35 = vpop.xlane.xlu0 %1475 }
 0x5b9   : > { %2625 = vrcp.f32 %v1476_v35  ;;  %2301 = vmatprep.mubr.msk.bf16.mxu0 %vm3284_vm0, %v3283_v0 }
 0x5bb   : > { %v2624_v36 = vpop.eup %2623 }
 0x5bc   : > { %v1362_v37 = vmul.f32 %v2624_v36, %v2616_v20  ;;  %v1365_v38 = vpop.permute.xlu0 %1364  ;;  %v2601_v20 = vld [vmem:[#allocation25] sm:$0xff]  }
 0x5bd   : > { %v1370_v39 = vsel %vm1134_vm4, %v1365_v38, 0  ;;  %v2610_v38 = vld [vmem:[#allocation28 + $0x38] sm:$0xff]  }
 0x5be   : > { %2300 = vmatpush3.bf16.msra.mxu0 %v1370_v39  ;;  %v1363_v41 = vpack.c.bf16 %v1362_v37, %v1362_v37  ;;  %v2609_v37 = vld [vmem:[#allocation28 + $0x30] sm:$0xff]   ;;  %v2186_v39 = vld [vmem:[#allocation26] ss:$0 sm:$0xff] }
 0x5bf   : > { %2311 = vmatprep.subr.bf16.mxu0 %v3283_v0 }
 0x5c1   : > { %2302 = vmatmul.mubr.msk.bf16.vlgmr.msra.gmra.mrb[20].mxu0 %vm1072_vm3, %v1363_v41 }
 0x5c2   : > { %2312 = vmatpush3.bf16.msra.mxu0 %v1486_v42  ;;  %2313 = vmatprep.mubr.msk.bf16.mxu0 %vm3284_vm0, %v3283_v0 }
 0x5c3   : > { %v2626_v43 = vpop.eup %2625  ;;  %2325 = vmatprep.subr.bf16.mxu0 %v3283_v0 }
 0x5c4   : > { %v1478_v44 = vmul.f32 %v2626_v43, %v2618_v22  ;;  %v2603_v22 = vld [vmem:[#allocation28] sm:$0xff]  }
 0x5c6   : > { %v1479_v45 = vpack.c.bf16 %v1478_v44, %v1478_v44 }
 0x5c9   : > { %2314 = vmatmul.mubr.msk.bf16.vlgmr.msra.gmra.mrb[24].mxu0 %vm1072_vm3, %v1479_v45 }
 0x5ca   : > { %2329 = vmatprep.mubr.msk.bf16.mxu0 %vm3284_vm0, %v3283_v0  ;;  %2326 = vmatpush3.bf16.msra.mxu0 %v2601_v20 }
 0x5cb   : > { %2327 = vmatprep.subr.bf16.mxu0 %v3283_v0 }
 0x5ce   : > { %2328 = vmatpush3.bf16.msra.mxu0 %v2602_v21 }
 0x617   : > { %v1172_v46 = vpop.f32.mrb[12].mxu0 }
 0x618   : > { %1178 = vst.msk [vmem:[#allocation4] sm:$0xff] %vm1072_vm3, %v1172_v46  ;;  %v2279_v47 = vpop.f32.mrb[13].mxu0 }
 0x619   : > { %v1175_v48 = vpop.f32.mrb[14].mxu0  ;;  %v2190_v47 = vld [vmem:[#allocation29] ss:$0 sm:$0xff] }
 0x61a   : > { %v2280_v49 = vpop.f32.mrb[15].mxu0 }
 0x68b   : > { %v1290_v50 = vpop.f32.mrb[16].mxu0 }
 0x68c   : > { %1297 = vrot.lane.b32.xlu1 %v1290_v50, %s3288_s0  ;;  %v2291_v51 = vpop.f32.mrb[17].mxu0 }
 0x68d   : > { %v1293_v52 = vpop.f32.mrb[18].mxu0 }
 0x68e   : > { %v2292_v53 = vpop.f32.mrb[19].mxu0 }
 0x694   : > { %v1406_v56 = vpop.f32.mrb[20].mxu0 }
 0x695   : > { %1413 = vrot.lane.b32.xlu0 %v1406_v56, %s3289_s20  ;;  %v2303_v57 = vpop.f32.mrb[21].mxu0 }
 0x696   : > { %v1409_v58 = vpop.f32.mrb[22].mxu0 }
 0x697   : > { %v2304_v59 = vpop.f32.mrb[23].mxu0 }
 0x69c   : > { %v1522_v60 = vpop.f32.mrb[24].mxu0 }
 0x69d   : > { %1529 = vrot.lane.b32.xlu1 %v1522_v60, %s3290_s1  ;;  %v2315_v61 = vpop.f32.mrb[25].mxu0 }
 0x69e   : > { %v1525_v62 = vpop.f32.mrb[26].mxu0 }
 0x69f   : > { %v2316_v63 = vpop.f32.mrb[27].mxu0 }
 0x6a0   : > { %v2199_v63 = vld [vmem:[#allocation31] ss:$0 sm:$0xff] }
 0x6fe   : > { %v1298_v1 = vpop.permute.xlu1 %1297 }
 0x6ff   : > { %1301 = vst.msk [vmem:[#allocation4] sm:$0xff] %vm1300_vm5, %v1298_v1 }
 0x707   : > { %v1414_v2 = vpop.permute.xlu0 %1413 }
 0x708   : > { %1417 = vst.msk [vmem:[#allocation4] sm:$0xff] %vm1416_vm6, %v1414_v2  ;;  %v2200_v2 = vld [vmem:[#allocation32] ss:$0 sm:$0xff] }
 0x70f   : > { %v1530_v3 = vpop.permute.xlu1 %1529 }
 0x710   : > { %1533 = vst.msk [vmem:[#allocation4] sm:$0xff] %vm1532_vm7, %v1530_v3 }
 0x717   : > { %v1534_v4 = vld [vmem:[#allocation4] sm:$0xff] }
 0x718   : > { %v1535_v5 = vpack.c.bf16 %v1534_v4, %v1534_v4 }
 0x71a   : > { %2322 = vmatmul.mubr.msk.bf16.vlgmr.msra.gmra.mrb[16].mxu1 %vm889_vm1, %v1535_v5 }
 0x71b   : > { %2349 = vmatprep.mubr.msk.bf16.mxu1 %vm3284_vm0, %v3283_v0  ;;  %2334 = vmatpush3.bf16.msra.mxu1 %v2603_v22 }
 0x71c   : > { %2335 = vmatprep.subr.bf16.mxu1 %v3283_v0 }
 0x71f   : > { %2336 = vmatpush3.bf16.msra.mxu1 %v2604_v23 }
 0x720   : > { %2337 = vmatprep.subr.bf16.mxu1 %v3283_v0 }
 0x7ed   : > { %v1596_v7 = vpop.f32.mrb[16].mxu1 }
 0x7ee   : > { %v1597_v9 = vadd.f32 %v2180_v6, %v1596_v7  ;;  %v2323_v10 = vpop.f32.mrb[17].mxu1 }
 0x7ef   : > { %v1599_v11 = vpop.f32.mrb[18].mxu1 }
 0x7f0   : > { %v2324_v12 = vpop.f32.mrb[19].mxu1  ;;  %v1602_v13 = vadd.f32 %v1597_v9, %v3950_v8  ;;  %v2605_v8 = vld [vmem:[#allocation28 + $0x10] sm:$0xff]  }
 0x7f1   : > { %2338 = vmatpush3.bf16.msra.mxu1 %v2605_v8 }
 0x7f2   : > { %v1605_v14 = vsel %vm889_vm1, %v1602_v13, 0.0  ;;  %2339 = vmatprep.subr.bf16.mxu1 %v3283_v0 }
 0x7f3   : > { %1606 = vadd.xlane.f32.xlu0 %v1605_v14 }
 0x7f5   : > { %2340 = vmatpush3.bf16.msra.mxu1 %v2606_v24 }
 0x7f6   : > { %2341 = vmatprep.subr.bf16.mxu1 %v3283_v0 }
 0x7f9   : > { %2342 = vmatpush3.bf16.msra.mxu1 %v2607_v25 }
 0x7fa   : > { %2343 = vmatprep.subr.bf16.mxu1 %v3283_v0 }
 0x7fd   : > { %2344 = vmatpush3.bf16.msra.mxu1 %v2608_v26 }
 0x7fe   : > { %2345 = vmatprep.subr.bf16.mxu1 %v3283_v0 }
 0x801   : > { %2346 = vmatpush3.bf16.msra.mxu1 %v2609_v37 }
 0x802   : > { %2347 = vmatprep.subr.bf16.mxu1 %v3283_v0 }
 0x805   : > { %2348 = vmatpush3.bf16.msra.mxu1 %v2610_v38 }
 0x880   : > { %v1607_v15 = vpop.xlane.xlu0 %1606 }
 0x881   : > { %v1609_v16 = vmul.f32 0.03125, %v1607_v15 }
 0x883   : > { %v1610_v17 = vsub.f32 %v1602_v13, %v1609_v16 }
 0x885   : > { %v1611_v18 = vmul.f32 %v1610_v17, %v1610_v17 }
 0x887   : > { %v1612_v19 = vsel %vm889_vm1, %v1611_v18, 0.0 }
 0x888   : > { %1613 = vadd.xlane.f32.xlu1 %v1612_v19 }
 0x915   : > { %v1614_v27 = vpop.xlane.xlu1 %1613 }
 0x916   : > { %v1615_v28 = vmul.f32 0.03125, %v1614_v27 }
 0x918   : > { %v1616_v29 = vadd.f32 1e-05, %v1615_v28 }
 0x91a   : > { %2627 = vrsqrt.f32 %v1616_v29 }
 0x924   : > { %v2628_v30 = vpop.eup %2627 }
 0x925   : > { %v1618_v32 = vmul.f32 %v2628_v30, %v1610_v17 }
 0x927   : > { %v1625_v34 = vmul.f32 %v2184_v31, %v1618_v32 }
 0x929   : > { %v1632_v35 = vadd.f32 %v2185_v33, %v1625_v34 }
 0x92b   : > { %v1633_v36 = vpack.c.bf16 %v1632_v35, %v1632_v35 }
 0x92d   : > { %2330 = vmatmul.mubr.msk.bf16.vlgmr.msra.gmra.mrb[28].mxu0 %vm889_vm1, %v1633_v36 }
 0xa00   : > { %v1694_v40 = vpop.f32.mrb[28].mxu0 }
 0xa01   : > { %v1695_v41 = vadd.f32 %v2186_v39, %v1694_v40  ;;  %v2331_v42 = vpop.f32.mrb[29].mxu0 }
 0xa02   : > { %v1697_v43 = vpop.f32.mrb[30].mxu0 }
 0xa03   : > { %v1700_v44 = vmax.f32 %v1695_v41, 0.0  ;;  %v2332_v45 = vpop.f32.mrb[31].mxu0 }
 0xa05   : > { %v1701_v46 = vpack.c.bf16 %v1700_v44, %v1700_v44 }
 0xa07   : > { %2350 = vmatmul.mubr.bf16.vlgmr.msra.gmra.mrb[20].mxu1 %v1701_v46 }
 0xada   : > { %v1807_v48 = vpop.f32.mrb[20].mxu1 }
 0xadb   : > { %v1808_v49 = vadd.f32 %v2190_v47, %v1807_v48  ;;  %v2351_v50 = vpop.f32.mrb[21].mxu1 }
 0xadc   : > { %v1810_v51 = vpop.f32.mrb[22].mxu1 }
 0xadd   : > { %v2352_v52 = vpop.f32.mrb[23].mxu1  ;;  %v1813_v53 = vadd.f32 %v1808_v49, %v1632_v35 }
 0xadf   : > { %v1816_v0 = vsel %vm889_vm1, %v1813_v53, 0.0 }
 0xae0   : > { %1817 = vadd.xlane.f32.xlu0 %v1816_v0 }
 0xb6d   : > { %v1818_v54 = vpop.xlane.xlu0 %1817 }
 0xb6e   : > { %v1819_v55 = vmul.f32 0.03125, %v1818_v54 }
 0xb70   : > { %v1820_v56 = vsub.f32 %v1813_v53, %v1819_v55 }
 0xb72   : > { %v1821_v57 = vmul.f32 %v1820_v56, %v1820_v56 }
 0xb74   : > { %v1822_v58 = vsel %vm889_vm1, %v1821_v57, 0.0 }
 0xb75   : > { %1823 = vadd.xlane.f32.xlu0 %v1822_v58 }
 0xc02   : > { %v1824_v59 = vpop.xlane.xlu0 %1823 }
 0xc03   : > { %v1825_v60 = vmul.f32 0.03125, %v1824_v59 }
 0xc05   : > { %v1826_v61 = vadd.f32 1e-05, %v1825_v60 }
 0xc07   : > { %2629 = vrsqrt.f32 %v1826_v61 }
 0xc11   : > { %v2630_v62 = vpop.eup %2629 }
 0xc12   : > { %v1828_v1 = vmul.f32 %v2630_v62, %v1820_v56 }
 0xc14   : > { %v1835_v3 = vmul.f32 %v2199_v63, %v1828_v1 }
 0xc16   : > { %v1842_v4 = vadd.f32 %v2200_v2, %v1835_v3 }
 0xc18   : > { %1843 = vst.msk [vmem:[%s856_s19] sm:$0xff] %vm889_vm1, %v1842_v4 }
 0xc19   : > { %3152 = shalt.err (!%p3149_p7)
}
 0xc1a   : > { %s3153_s21 = scalar_lea.hbm %s4042_s9, 128  ;;  %s3157_s20 = scalar_lea.hbm %s4209_s8, 256 }
 0xc1b   : > { %p3154_p12 = scmp.ne.s32.totalorder %s4042_s9, %s3153_s21  ;;  %p3158_p1 = scmp.lt.u32.totalorder %s4042_s9, %s4209_s8 }
 0xc1c   : > { %p3159_p5 = scmp.lt.u32.totalorder %s3157_s20, %s3153_s21  ;;  %p3161_p3 = scmp.lt.u32.totalorder %s3153_s21, %s4042_s9 }
 0xc1d   : > { %p3155_p2 = pnand %p3154_p12, %p4210_p11 }
 0xc1e   : > { %p3160_p8 = por %p3159_p5, %p3158_p1 }
 0xc1f   : > { %p3156_p10 = pneg %p3155_p2 }
 0xc20   : > { %p3162_p6 = por %p3161_p3, %p3160_p8 }
 0xc22   : > { %p3163_p13 = pnand %p3162_p6, %p3156_p10 }
 0xc24   : > { %3166 = shalt.err (!%p3163_p13)
}
 0xc25   : > { %2421 = dma.vmem_to_hbm [thread:$0]  (%p4210_p11), %s4044_s5, 128, %s4042_s9, %s1845_s30  }
 0xc26 PF: > { %s4211_s10 = sld [smem:[#allocation47_spill]]  ;;  %s4212_s19 = sld [smem:[#allocation52_spill]] }
 0xc27   : > { %p4213_p4 = scmp.ne.s32.totalorder %s4180_s18, 0 }
 0xc2c   : > { %s1871_s7 = sand.u32 1, %s4211_s10   ;;  %p4214_p9 = scmp.ge.s32.totalorder %s4212_s19, 2 }
 0xc2d   : > { %s1872_s6 = scalar_lea.sflag [#allocation7], %s1871_s7 }
 0xc2e   : > { %p2480_p0 = pnand %p4214_p9, %p4213_p4 }
 0xc30   : > { %3236 = dma.done.wait (!%p2480_p0), %s1872_s6, 128  }
 0xc31   : > { %3238 = vsyncadd (!%p2480_p0), %s1872_s6, 4294967168  ;;  %s45_s19 = sadd.s32 1, %s4212_s19   ;;  %s4215_s22 = sld [smem:[#allocation48_spill]] }
 0xc32   : > { %p42_p7 = scmp.ge.s32.totalorder %s45_s19, 4   ;;  %s4216_s28 = sld [smem:[#allocation49_spill]] }
 0xc33   : > { %s4217_s23 = smov %s3793_s27  ;;  %s4218_s30 = sld [smem:[#allocation51_spill]] }
 0xc34   : > { %s4219_s26 = smov %s4224_s29  ;;  %s4221_s29 = smov %s4217_s23 }
 0xc35   : > { %s4222_s0 = smov %s4219_s26  ;;  %44 = sbr.rel (!%p42_p7) target bundleno = 30 (0x1e), region = 218 }
 0xc37   : > { %s4220_s27 = smov %s4215_s22 }
 0xc3c   :  { %1877 = vsyncpa [#allocation6], 1 }
 0xc3d   :  { %1879 = vsyncpa [#allocation6 + $0x1], 1 }
 0xc3e   :  { %1880 = vsyncpa [#allocation9], 1 }
 0xc3f   :  { %1882 = vsyncpa [#allocation9 + $0x1], 1 }
 0xc40   :  { %1883 = vsyncpa [#allocation12], 1 }
 0xc41   :  { %1884 = vsyncpa [#allocation15], 1 }
 0xc42   :  { %1885 = vsyncpa [#allocation18], 1 }
 0xc43   :  { %1886 = vsyncpa [#allocation21], 1 }
 0xc44   :  { %1887 = vsyncpa [#allocation24], 1 }
 0xc45   :  { %1888 = vsyncpa [#allocation27], 1 }
 0xc46   :  { %1889 = vsyncpa [#allocation30], 1 }
 0xc47   :  { %1890 = vsyncpa [#allocation33], 1 }
 0xc48   :  { %1891 = vsyncpa [#allocation7], 1 }
 0xc49   :  { %1893 = vsyncpa [#allocation7 + $0x1], 1 }

</bundles_post_ra>
